<compile_context>
chip_gen: v6e
topology: v6e:2x2x1
jax: 0.10.0
libtpu: 0.0.40
codegen_flags: <defaults>
</compile_context>

<pallas_src>
import functools

import jax
import jax.numpy as jnp
from jax.experimental import pallas as pl
from jax.experimental.pallas import tpu as pltpu


def _resblock_kernel(x_ref, w1_ref, b1_ref, w2_ref, b2_ref, o_ref, *, width):
    """Single invocation computes the whole batch.

    x_ref : (Cpad, L)       VMEM  -- input, channels on sublanes (padded to 8),
                                     lane index = n*H*W + y*W + x
    w1_ref: (Cout, Cin*9)   VMEM  -- conv1 weights, column t = ci*9 + dy*3 + dx
    b1_ref: (Cout, 1)       VMEM  -- conv1 bias
    w2_ref: (Cout, Cout)    VMEM  -- conv2 (1x1) weights [co2, co1]
    b2_ref: (Cout, 1)       VMEM  -- conv2 bias
    o_ref : (Cout, L)       VMEM  -- lane-dense padded output slab
    """
    _, L = x_ref.shape
    cout = o_ref.shape[0]
    cin = w1_ref.shape[1] // 9            # true channel count (sublanes 0..cin-1)

    x = x_ref[...]                        # (Cpad, L)
    w1 = w1_ref[...]                      # (Cout, Cin*9), one vreg
    w2 = w2_ref[...]                      # (Cout, Cout),  one vreg

    # ---- conv1: 3x3 VALID + ReLU, dense (Cout, L) accumulator on the VPU ----
    acc = jnp.broadcast_to(b1_ref[...], (cout, L)).astype(jnp.float32)
    for dy in range(3):
        for dx in range(3):
            s = dy * width + dx
            # rolled[i] = x[i + s]  (== jnp.roll(x, -s)).  Wrapped lanes only
            # pollute output positions that the wrapper discards.
            x_s = x if s == 0 else pltpu.roll(x, shift=L - s, axis=1)
            for ci in range(cin):
                t = ci * 9 + dy * 3 + dx
                # One full-density FMA serves all Cout output channels:
                # (Cout,1) weight column x (1,L) shifted input row -> (Cout,L).
                acc = acc + w1[:, t:t + 1] * x_s[ci:ci + 1, :]
    h1 = jnp.maximum(acc, 0.0)            # ReLU, (Cout, L)

    # ---- conv2: 1x1 + ReLU (Cout dense channel-mix FMAs) --------------------
    acc2 = jnp.broadcast_to(b2_ref[...], (cout, L)).astype(jnp.float32)
    for c1 in range(cout):
        acc2 = acc2 + w2[:, c1:c1 + 1] * h1[c1:c1 + 1, :]

    # Lane-dense, unmasked full-slab store (512 lanes, multiple of 128).
    o_ref[...] = jnp.maximum(acc2, 0.0).astype(o_ref.dtype)


@jax.jit
def residual_block_3_3(x_nchw, w1_oihw, b1, w2_oihw, b2):
    """Forward pass matching the PyTorch module (NCHW in, NCHW out).

    x_nchw : (N, Cin, H, W) float32
    w1_oihw: (Cout, Cin, 3, 3) float32   (PyTorch conv1 weight layout)
    b1     : (Cout,)
    w2_oihw: (Cout, Cout, 1, 1)          (PyTorch conv2 weight layout)
    b2     : (Cout,)
    returns: (N, Cout, H-2, W-2) float32
    """
    n, cin, H, W = x_nchw.shape
    cout = w1_oihw.shape[0]
    hout, wout = H - 2, W - 2
    L = n * H * W

    # Layout plumbing only (no compute hoisted into the wrapper):
    # channels -> sublanes (padded to a full 8-sublane vreg), (n, y, x) -> lanes.
    cpad = max(8, cin)
    x_flat = jnp.transpose(x_nchw, (1, 0, 2, 3)).reshape(cin, L)
    x_flat = jnp.pad(x_flat, ((0, cpad - cin), (0, 0)))

    w1_mat = w1_oihw.reshape(cout, cin * 9)     # column t = ci*9 + dy*3 + dx
    w2_mat = w2_oihw[:, :, 0, 0]                # (Cout, Cout), [co2, co1]
    b1_col = b1.reshape(cout, 1)
    b2_col = b2.reshape(cout, 1)

    vmem = pl.BlockSpec(memory_space=pltpu.MemorySpace.VMEM)
    out_slab = pl.pallas_call(
        functools.partial(_resblock_kernel, width=W),
        out_shape=jax.ShapeDtypeStruct((cout, L), x_nchw.dtype),
        in_specs=[vmem, vmem, vmem, vmem, vmem],
        out_specs=vmem,
    )(x_flat, w1_mat, b1_col, w2_mat, b2_col)

    # Valid-region slice back to NCHW; positions with y >= hout or x >= wout
    # hold wrap-around garbage by construction and are discarded here.
    out = out_slab.reshape(cout, n, H, W).transpose(1, 0, 2, 3)[:, :, :hout, :wout]
    return out


def _reference(x_nchw, w1_oihw, b1, w2_oihw, b2):
    """Pure-JAX reference (mirrors the PyTorch forward) for correctness checking."""
    dn = jax.lax.conv_dimension_numbers(
        x_nchw.shape, w1_oihw.shape, ("NCHW", "OIHW", "NCHW"))
    out = jax.lax.conv_general_dilated(
        x_nchw, w1_oihw, window_strides=(1, 1), padding="VALID",
        dimension_numbers=dn) + b1[None, :, None, None]
    out = jnp.maximum(out, 0.0)
    out = jax.lax.conv_general_dilated(
        out, w2_oihw, window_strides=(1, 1), padding="VALID",
        dimension_numbers=dn) + b2[None, :, None, None]
    out = jnp.maximum(out, 0.0)
    return out


if __name__ == "__main__":
    # Small deterministic setup: batch=2, in_ch=4, out_ch=8, spatial=16.
    N, C_IN, C_OUT, H, W = 2, 4, 8, 16, 16

    key = jax.random.PRNGKey(0)
    kx, k1, kb1, k2, kb2 = jax.random.split(key, 5)

    x = jax.random.normal(kx, (N, C_IN, H, W), dtype=jnp.float32)
    w1 = jax.random.normal(k1, (C_OUT, C_IN, 3, 3), dtype=jnp.float32) * 0.1
    b1 = jax.random.normal(kb1, (C_OUT,), dtype=jnp.float32) * 0.1
    w2 = jax.random.normal(k2, (C_OUT, C_OUT, 1, 1), dtype=jnp.float32) * 0.1
    b2 = jax.random.normal(kb2, (C_OUT,), dtype=jnp.float32) * 0.1

    out = jax.block_until_ready(residual_block_3_3(x, w1, b1, w2, b2))

    ref = _reference(x, w1, b1, w2, b2)
    assert out.shape == (N, C_OUT, H - 2, W - 2), out.shape
    assert jnp.allclose(out, ref, atol=1e-4, rtol=1e-4), "mismatch vs reference"

    print("KERNEL_OK")
</pallas_src>

<mosaic_0001>
module attributes {stable_mosaic.version = 11 : i64} {
  func.func @_resblock_kernel(%arg0: memref<8x512xf32, #tpu.memory_space<vmem>>, %arg1: memref<8x36xf32, #tpu.memory_space<vmem>>, %arg2: memref<8x1xf32, #tpu.memory_space<vmem>>, %arg3: memref<8x8xf32, #tpu.memory_space<vmem>>, %arg4: memref<8x1xf32, #tpu.memory_space<vmem>>, %arg5: memref<8x512xf32, #tpu.memory_space<vmem>>) attributes {dimension_semantics = [], scalar_prefetch = 0 : i64, scratch_operands = 0 : i64, tpu.core_type = #tpu.core_type<tc>} {
    %c0 = arith.constant 0 : index
    %c0_0 = arith.constant 0 : index
    %0 = vector.load %arg0[%c0, %c0_0] : memref<8x512xf32, #tpu.memory_space<vmem>>, vector<8x512xf32>
    %c0_1 = arith.constant 0 : index
    %c0_2 = arith.constant 0 : index
    %1 = vector.load %arg1[%c0_1, %c0_2] : memref<8x36xf32, #tpu.memory_space<vmem>>, vector<8x36xf32>
    %c0_3 = arith.constant 0 : index
    %c0_4 = arith.constant 0 : index
    %2 = vector.load %arg3[%c0_3, %c0_4] : memref<8x8xf32, #tpu.memory_space<vmem>>, vector<8x8xf32>
    %c0_5 = arith.constant 0 : index
    %c0_6 = arith.constant 0 : index
    %3 = vector.load %arg2[%c0_5, %c0_6] : memref<8x1xf32, #tpu.memory_space<vmem>>, vector<8x1xf32>
    %4 = vector.shape_cast %3 : vector<8x1xf32> to vector<8x1xf32>
    %5 = vector.broadcast %4 : vector<8x1xf32> to vector<8x512xf32>
    %6 = vector.extract_strided_slice %1 {offsets = [0, 0], sizes = [8, 1], strides = [1, 1]} : vector<8x36xf32> to vector<8x1xf32>
    %7 = vector.extract_strided_slice %0 {offsets = [0, 0], sizes = [1, 512], strides = [1, 1]} : vector<8x512xf32> to vector<1x512xf32>
    %8 = vector.broadcast %6 : vector<8x1xf32> to vector<8x512xf32>
    %9 = vector.broadcast %7 : vector<1x512xf32> to vector<8x512xf32>
    %10 = arith.mulf %8, %9 : vector<8x512xf32>
    %11 = arith.addf %5, %10 : vector<8x512xf32>
    %12 = vector.extract_strided_slice %1 {offsets = [0, 9], sizes = [8, 1], strides = [1, 1]} : vector<8x36xf32> to vector<8x1xf32>
    %13 = vector.extract_strided_slice %0 {offsets = [1, 0], sizes = [1, 512], strides = [1, 1]} : vector<8x512xf32> to vector<1x512xf32>
    %14 = vector.broadcast %12 : vector<8x1xf32> to vector<8x512xf32>
    %15 = vector.broadcast %13 : vector<1x512xf32> to vector<8x512xf32>
    %16 = arith.mulf %14, %15 : vector<8x512xf32>
    %17 = arith.addf %11, %16 : vector<8x512xf32>
    %18 = vector.extract_strided_slice %1 {offsets = [0, 18], sizes = [8, 1], strides = [1, 1]} : vector<8x36xf32> to vector<8x1xf32>
    %19 = vector.extract_strided_slice %0 {offsets = [2, 0], sizes = [1, 512], strides = [1, 1]} : vector<8x512xf32> to vector<1x512xf32>
    %20 = vector.broadcast %18 : vector<8x1xf32> to vector<8x512xf32>
    %21 = vector.broadcast %19 : vector<1x512xf32> to vector<8x512xf32>
    %22 = arith.mulf %20, %21 : vector<8x512xf32>
    %23 = arith.addf %17, %22 : vector<8x512xf32>
    %24 = vector.extract_strided_slice %1 {offsets = [0, 27], sizes = [8, 1], strides = [1, 1]} : vector<8x36xf32> to vector<8x1xf32>
    %25 = vector.extract_strided_slice %0 {offsets = [3, 0], sizes = [1, 512], strides = [1, 1]} : vector<8x512xf32> to vector<1x512xf32>
    %26 = vector.broadcast %24 : vector<8x1xf32> to vector<8x512xf32>
    %27 = vector.broadcast %25 : vector<1x512xf32> to vector<8x512xf32>
    %28 = arith.mulf %26, %27 : vector<8x512xf32>
    %29 = arith.addf %23, %28 : vector<8x512xf32>
    %c511_i32 = arith.constant 511 : i32
    %30 = tpu.dynamic_rotate %0 by %c511_i32 dim 1 : vector<8x512xf32>, i32 -> vector<8x512xf32>
    %31 = vector.extract_strided_slice %1 {offsets = [0, 1], sizes = [8, 1], strides = [1, 1]} : vector<8x36xf32> to vector<8x1xf32>
    %32 = vector.extract_strided_slice %30 {offsets = [0, 0], sizes = [1, 512], strides = [1, 1]} : vector<8x512xf32> to vector<1x512xf32>
    %33 = vector.broadcast %31 : vector<8x1xf32> to vector<8x512xf32>
    %34 = vector.broadcast %32 : vector<1x512xf32> to vector<8x512xf32>
    %35 = arith.mulf %33, %34 : vector<8x512xf32>
    %36 = arith.addf %29, %35 : vector<8x512xf32>
    %37 = vector.extract_strided_slice %1 {offsets = [0, 10], sizes = [8, 1], strides = [1, 1]} : vector<8x36xf32> to vector<8x1xf32>
    %38 = vector.extract_strided_slice %30 {offsets = [1, 0], sizes = [1, 512], strides = [1, 1]} : vector<8x512xf32> to vector<1x512xf32>
    %39 = vector.broadcast %37 : vector<8x1xf32> to vector<8x512xf32>
    %40 = vector.broadcast %38 : vector<1x512xf32> to vector<8x512xf32>
    %41 = arith.mulf %39, %40 : vector<8x512xf32>
    %42 = arith.addf %36, %41 : vector<8x512xf32>
    %43 = vector.extract_strided_slice %1 {offsets = [0, 19], sizes = [8, 1], strides = [1, 1]} : vector<8x36xf32> to vector<8x1xf32>
    %44 = vector.extract_strided_slice %30 {offsets = [2, 0], sizes = [1, 512], strides = [1, 1]} : vector<8x512xf32> to vector<1x512xf32>
    %45 = vector.broadcast %43 : vector<8x1xf32> to vector<8x512xf32>
    %46 = vector.broadcast %44 : vector<1x512xf32> to vector<8x512xf32>
    %47 = arith.mulf %45, %46 : vector<8x512xf32>
    %48 = arith.addf %42, %47 : vector<8x512xf32>
    %49 = vector.extract_strided_slice %1 {offsets = [0, 28], sizes = [8, 1], strides = [1, 1]} : vector<8x36xf32> to vector<8x1xf32>
    %50 = vector.extract_strided_slice %30 {offsets = [3, 0], sizes = [1, 512], strides = [1, 1]} : vector<8x512xf32> to vector<1x512xf32>
    %51 = vector.broadcast %49 : vector<8x1xf32> to vector<8x512xf32>
    %52 = vector.broadcast %50 : vector<1x512xf32> to vector<8x512xf32>
    %53 = arith.mulf %51, %52 : vector<8x512xf32>
    %54 = arith.addf %48, %53 : vector<8x512xf32>
    %c510_i32 = arith.constant 510 : i32
    %55 = tpu.dynamic_rotate %0 by %c510_i32 dim 1 : vector<8x512xf32>, i32 -> vector<8x512xf32>
    %56 = vector.extract_strided_slice %1 {offsets = [0, 2], sizes = [8, 1], strides = [1, 1]} : vector<8x36xf32> to vector<8x1xf32>
    %57 = vector.extract_strided_slice %55 {offsets = [0, 0], sizes = [1, 512], strides = [1, 1]} : vector<8x512xf32> to vector<1x512xf32>
    %58 = vector.broadcast %56 : vector<8x1xf32> to vector<8x512xf32>
    %59 = vector.broadcast %57 : vector<1x512xf32> to vector<8x512xf32>
    %60 = arith.mulf %58, %59 : vector<8x512xf32>
    %61 = arith.addf %54, %60 : vector<8x512xf32>
    %62 = vector.extract_strided_slice %1 {offsets = [0, 11], sizes = [8, 1], strides = [1, 1]} : vector<8x36xf32> to vector<8x1xf32>
    %63 = vector.extract_strided_slice %55 {offsets = [1, 0], sizes = [1, 512], strides = [1, 1]} : vector<8x512xf32> to vector<1x512xf32>
    %64 = vector.broadcast %62 : vector<8x1xf32> to vector<8x512xf32>
    %65 = vector.broadcast %63 : vector<1x512xf32> to vector<8x512xf32>
    %66 = arith.mulf %64, %65 : vector<8x512xf32>
    %67 = arith.addf %61, %66 : vector<8x512xf32>
    %68 = vector.extract_strided_slice %1 {offsets = [0, 20], sizes = [8, 1], strides = [1, 1]} : vector<8x36xf32> to vector<8x1xf32>
    %69 = vector.extract_strided_slice %55 {offsets = [2, 0], sizes = [1, 512], strides = [1, 1]} : vector<8x512xf32> to vector<1x512xf32>
    %70 = vector.broadcast %68 : vector<8x1xf32> to vector<8x512xf32>
    %71 = vector.broadcast %69 : vector<1x512xf32> to vector<8x512xf32>
    %72 = arith.mulf %70, %71 : vector<8x512xf32>
    %73 = arith.addf %67, %72 : vector<8x512xf32>
    %74 = vector.extract_strided_slice %1 {offsets = [0, 29], sizes = [8, 1], strides = [1, 1]} : vector<8x36xf32> to vector<8x1xf32>
    %75 = vector.extract_strided_slice %55 {offsets = [3, 0], sizes = [1, 512], strides = [1, 1]} : vector<8x512xf32> to vector<1x512xf32>
    %76 = vector.broadcast %74 : vector<8x1xf32> to vector<8x512xf32>
    %77 = vector.broadcast %75 : vector<1x512xf32> to vector<8x512xf32>
    %78 = arith.mulf %76, %77 : vector<8x512xf32>
    %79 = arith.addf %73, %78 : vector<8x512xf32>
    %c496_i32 = arith.constant 496 : i32
    %80 = tpu.dynamic_rotate %0 by %c496_i32 dim 1 : vector<8x512xf32>, i32 -> vector<8x512xf32>
    %81 = vector.extract_strided_slice %1 {offsets = [0, 3], sizes = [8, 1], strides = [1, 1]} : vector<8x36xf32> to vector<8x1xf32>
    %82 = vector.extract_strided_slice %80 {offsets = [0, 0], sizes = [1, 512], strides = [1, 1]} : vector<8x512xf32> to vector<1x512xf32>
    %83 = vector.broadcast %81 : vector<8x1xf32> to vector<8x512xf32>
    %84 = vector.broadcast %82 : vector<1x512xf32> to vector<8x512xf32>
    %85 = arith.mulf %83, %84 : vector<8x512xf32>
    %86 = arith.addf %79, %85 : vector<8x512xf32>
    %87 = vector.extract_strided_slice %1 {offsets = [0, 12], sizes = [8, 1], strides = [1, 1]} : vector<8x36xf32> to vector<8x1xf32>
    %88 = vector.extract_strided_slice %80 {offsets = [1, 0], sizes = [1, 512], strides = [1, 1]} : vector<8x512xf32> to vector<1x512xf32>
    %89 = vector.broadcast %87 : vector<8x1xf32> to vector<8x512xf32>
    %90 = vector.broadcast %88 : vector<1x512xf32> to vector<8x512xf32>
    %91 = arith.mulf %89, %90 : vector<8x512xf32>
    %92 = arith.addf %86, %91 : vector<8x512xf32>
    %93 = vector.extract_strided_slice %1 {offsets = [0, 21], sizes = [8, 1], strides = [1, 1]} : vector<8x36xf32> to vector<8x1xf32>
    %94 = vector.extract_strided_slice %80 {offsets = [2, 0], sizes = [1, 512], strides = [1, 1]} : vector<8x512xf32> to vector<1x512xf32>
    %95 = vector.broadcast %93 : vector<8x1xf32> to vector<8x512xf32>
    %96 = vector.broadcast %94 : vector<1x512xf32> to vector<8x512xf32>
    %97 = arith.mulf %95, %96 : vector<8x512xf32>
    %98 = arith.addf %92, %97 : vector<8x512xf32>
    %99 = vector.extract_strided_slice %1 {offsets = [0, 30], sizes = [8, 1], strides = [1, 1]} : vector<8x36xf32> to vector<8x1xf32>
    %100 = vector.extract_strided_slice %80 {offsets = [3, 0], sizes = [1, 512], strides = [1, 1]} : vector<8x512xf32> to vector<1x512xf32>
    %101 = vector.broadcast %99 : vector<8x1xf32> to vector<8x512xf32>
    %102 = vector.broadcast %100 : vector<1x512xf32> to vector<8x512xf32>
    %103 = arith.mulf %101, %102 : vector<8x512xf32>
    %104 = arith.addf %98, %103 : vector<8x512xf32>
    %c495_i32 = arith.constant 495 : i32
    %105 = tpu.dynamic_rotate %0 by %c495_i32 dim 1 : vector<8x512xf32>, i32 -> vector<8x512xf32>
    %106 = vector.extract_strided_slice %1 {offsets = [0, 4], sizes = [8, 1], strides = [1, 1]} : vector<8x36xf32> to vector<8x1xf32>
    %107 = vector.extract_strided_slice %105 {offsets = [0, 0], sizes = [1, 512], strides = [1, 1]} : vector<8x512xf32> to vector<1x512xf32>
    %108 = vector.broadcast %106 : vector<8x1xf32> to vector<8x512xf32>
    %109 = vector.broadcast %107 : vector<1x512xf32> to vector<8x512xf32>
    %110 = arith.mulf %108, %109 : vector<8x512xf32>
    %111 = arith.addf %104, %110 : vector<8x512xf32>
    %112 = vector.extract_strided_slice %1 {offsets = [0, 13], sizes = [8, 1], strides = [1, 1]} : vector<8x36xf32> to vector<8x1xf32>
    %113 = vector.extract_strided_slice %105 {offsets = [1, 0], sizes = [1, 512], strides = [1, 1]} : vector<8x512xf32> to vector<1x512xf32>
    %114 = vector.broadcast %112 : vector<8x1xf32> to vector<8x512xf32>
    %115 = vector.broadcast %113 : vector<1x512xf32> to vector<8x512xf32>
    %116 = arith.mulf %114, %115 : vector<8x512xf32>
    %117 = arith.addf %111, %116 : vector<8x512xf32>
    %118 = vector.extract_strided_slice %1 {offsets = [0, 22], sizes = [8, 1], strides = [1, 1]} : vector<8x36xf32> to vector<8x1xf32>
    %119 = vector.extract_strided_slice %105 {offsets = [2, 0], sizes = [1, 512], strides = [1, 1]} : vector<8x512xf32> to vector<1x512xf32>
    %120 = vector.broadcast %118 : vector<8x1xf32> to vector<8x512xf32>
    %121 = vector.broadcast %119 : vector<1x512xf32> to vector<8x512xf32>
    %122 = arith.mulf %120, %121 : vector<8x512xf32>
    %123 = arith.addf %117, %122 : vector<8x512xf32>
    %124 = vector.extract_strided_slice %1 {offsets = [0, 31], sizes = [8, 1], strides = [1, 1]} : vector<8x36xf32> to vector<8x1xf32>
    %125 = vector.extract_strided_slice %105 {offsets = [3, 0], sizes = [1, 512], strides = [1, 1]} : vector<8x512xf32> to vector<1x512xf32>
    %126 = vector.broadcast %124 : vector<8x1xf32> to vector<8x512xf32>
    %127 = vector.broadcast %125 : vector<1x512xf32> to vector<8x512xf32>
    %128 = arith.mulf %126, %127 : vector<8x512xf32>
    %129 = arith.addf %123, %128 : vector<8x512xf32>
    %c494_i32 = arith.constant 494 : i32
    %130 = tpu.dynamic_rotate %0 by %c494_i32 dim 1 : vector<8x512xf32>, i32 -> vector<8x512xf32>
    %131 = vector.extract_strided_slice %1 {offsets = [0, 5], sizes = [8, 1], strides = [1, 1]} : vector<8x36xf32> to vector<8x1xf32>
    %132 = vector.extract_strided_slice %130 {offsets = [0, 0], sizes = [1, 512], strides = [1, 1]} : vector<8x512xf32> to vector<1x512xf32>
    %133 = vector.broadcast %131 : vector<8x1xf32> to vector<8x512xf32>
    %134 = vector.broadcast %132 : vector<1x512xf32> to vector<8x512xf32>
    %135 = arith.mulf %133, %134 : vector<8x512xf32>
    %136 = arith.addf %129, %135 : vector<8x512xf32>
    %137 = vector.extract_strided_slice %1 {offsets = [0, 14], sizes = [8, 1], strides = [1, 1]} : vector<8x36xf32> to vector<8x1xf32>
    %138 = vector.extract_strided_slice %130 {offsets = [1, 0], sizes = [1, 512], strides = [1, 1]} : vector<8x512xf32> to vector<1x512xf32>
    %139 = vector.broadcast %137 : vector<8x1xf32> to vector<8x512xf32>
    %140 = vector.broadcast %138 : vector<1x512xf32> to vector<8x512xf32>
    %141 = arith.mulf %139, %140 : vector<8x512xf32>
    %142 = arith.addf %136, %141 : vector<8x512xf32>
    %143 = vector.extract_strided_slice %1 {offsets = [0, 23], sizes = [8, 1], strides = [1, 1]} : vector<8x36xf32> to vector<8x1xf32>
    %144 = vector.extract_strided_slice %130 {offsets = [2, 0], sizes = [1, 512], strides = [1, 1]} : vector<8x512xf32> to vector<1x512xf32>
    %145 = vector.broadcast %143 : vector<8x1xf32> to vector<8x512xf32>
    %146 = vector.broadcast %144 : vector<1x512xf32> to vector<8x512xf32>
    %147 = arith.mulf %145, %146 : vector<8x512xf32>
    %148 = arith.addf %142, %147 : vector<8x512xf32>
    %149 = vector.extract_strided_slice %1 {offsets = [0, 32], sizes = [8, 1], strides = [1, 1]} : vector<8x36xf32> to vector<8x1xf32>
    %150 = vector.extract_strided_slice %130 {offsets = [3, 0], sizes = [1, 512], strides = [1, 1]} : vector<8x512xf32> to vector<1x512xf32>
    %151 = vector.broadcast %149 : vector<8x1xf32> to vector<8x512xf32>
    %152 = vector.broadcast %150 : vector<1x512xf32> to vector<8x512xf32>
    %153 = arith.mulf %151, %152 : vector<8x512xf32>
    %154 = arith.addf %148, %153 : vector<8x512xf32>
    %c480_i32 = arith.constant 480 : i32
    %155 = tpu.dynamic_rotate %0 by %c480_i32 dim 1 : vector<8x512xf32>, i32 -> vector<8x512xf32>
    %156 = vector.extract_strided_slice %1 {offsets = [0, 6], sizes = [8, 1], strides = [1, 1]} : vector<8x36xf32> to vector<8x1xf32>
    %157 = vector.extract_strided_slice %155 {offsets = [0, 0], sizes = [1, 512], strides = [1, 1]} : vector<8x512xf32> to vector<1x512xf32>
    %158 = vector.broadcast %156 : vector<8x1xf32> to vector<8x512xf32>
    %159 = vector.broadcast %157 : vector<1x512xf32> to vector<8x512xf32>
    %160 = arith.mulf %158, %159 : vector<8x512xf32>
    %161 = arith.addf %154, %160 : vector<8x512xf32>
    %162 = vector.extract_strided_slice %1 {offsets = [0, 15], sizes = [8, 1], strides = [1, 1]} : vector<8x36xf32> to vector<8x1xf32>
    %163 = vector.extract_strided_slice %155 {offsets = [1, 0], sizes = [1, 512], strides = [1, 1]} : vector<8x512xf32> to vector<1x512xf32>
    %164 = vector.broadcast %162 : vector<8x1xf32> to vector<8x512xf32>
    %165 = vector.broadcast %163 : vector<1x512xf32> to vector<8x512xf32>
    %166 = arith.mulf %164, %165 : vector<8x512xf32>
    %167 = arith.addf %161, %166 : vector<8x512xf32>
    %168 = vector.extract_strided_slice %1 {offsets = [0, 24], sizes = [8, 1], strides = [1, 1]} : vector<8x36xf32> to vector<8x1xf32>
    %169 = vector.extract_strided_slice %155 {offsets = [2, 0], sizes = [1, 512], strides = [1, 1]} : vector<8x512xf32> to vector<1x512xf32>
    %170 = vector.broadcast %168 : vector<8x1xf32> to vector<8x512xf32>
    %171 = vector.broadcast %169 : vector<1x512xf32> to vector<8x512xf32>
    %172 = arith.mulf %170, %171 : vector<8x512xf32>
    %173 = arith.addf %167, %172 : vector<8x512xf32>
    %174 = vector.extract_strided_slice %1 {offsets = [0, 33], sizes = [8, 1], strides = [1, 1]} : vector<8x36xf32> to vector<8x1xf32>
    %175 = vector.extract_strided_slice %155 {offsets = [3, 0], sizes = [1, 512], strides = [1, 1]} : vector<8x512xf32> to vector<1x512xf32>
    %176 = vector.broadcast %174 : vector<8x1xf32> to vector<8x512xf32>
    %177 = vector.broadcast %175 : vector<1x512xf32> to vector<8x512xf32>
    %178 = arith.mulf %176, %177 : vector<8x512xf32>
    %179 = arith.addf %173, %178 : vector<8x512xf32>
    %c479_i32 = arith.constant 479 : i32
    %180 = tpu.dynamic_rotate %0 by %c479_i32 dim 1 : vector<8x512xf32>, i32 -> vector<8x512xf32>
    %181 = vector.extract_strided_slice %1 {offsets = [0, 7], sizes = [8, 1], strides = [1, 1]} : vector<8x36xf32> to vector<8x1xf32>
    %182 = vector.extract_strided_slice %180 {offsets = [0, 0], sizes = [1, 512], strides = [1, 1]} : vector<8x512xf32> to vector<1x512xf32>
    %183 = vector.broadcast %181 : vector<8x1xf32> to vector<8x512xf32>
    %184 = vector.broadcast %182 : vector<1x512xf32> to vector<8x512xf32>
    %185 = arith.mulf %183, %184 : vector<8x512xf32>
    %186 = arith.addf %179, %185 : vector<8x512xf32>
    %187 = vector.extract_strided_slice %1 {offsets = [0, 16], sizes = [8, 1], strides = [1, 1]} : vector<8x36xf32> to vector<8x1xf32>
    %188 = vector.extract_strided_slice %180 {offsets = [1, 0], sizes = [1, 512], strides = [1, 1]} : vector<8x512xf32> to vector<1x512xf32>
    %189 = vector.broadcast %187 : vector<8x1xf32> to vector<8x512xf32>
    %190 = vector.broadcast %188 : vector<1x512xf32> to vector<8x512xf32>
    %191 = arith.mulf %189, %190 : vector<8x512xf32>
    %192 = arith.addf %186, %191 : vector<8x512xf32>
    %193 = vector.extract_strided_slice %1 {offsets = [0, 25], sizes = [8, 1], strides = [1, 1]} : vector<8x36xf32> to vector<8x1xf32>
    %194 = vector.extract_strided_slice %180 {offsets = [2, 0], sizes = [1, 512], strides = [1, 1]} : vector<8x512xf32> to vector<1x512xf32>
    %195 = vector.broadcast %193 : vector<8x1xf32> to vector<8x512xf32>
    %196 = vector.broadcast %194 : vector<1x512xf32> to vector<8x512xf32>
    %197 = arith.mulf %195, %196 : vector<8x512xf32>
    %198 = arith.addf %192, %197 : vector<8x512xf32>
    %199 = vector.extract_strided_slice %1 {offsets = [0, 34], sizes = [8, 1], strides = [1, 1]} : vector<8x36xf32> to vector<8x1xf32>
    %200 = vector.extract_strided_slice %180 {offsets = [3, 0], sizes = [1, 512], strides = [1, 1]} : vector<8x512xf32> to vector<1x512xf32>
    %201 = vector.broadcast %199 : vector<8x1xf32> to vector<8x512xf32>
    %202 = vector.broadcast %200 : vector<1x512xf32> to vector<8x512xf32>
    %203 = arith.mulf %201, %202 : vector<8x512xf32>
    %204 = arith.addf %198, %203 : vector<8x512xf32>
    %c478_i32 = arith.constant 478 : i32
    %205 = tpu.dynamic_rotate %0 by %c478_i32 dim 1 : vector<8x512xf32>, i32 -> vector<8x512xf32>
    %206 = vector.extract_strided_slice %1 {offsets = [0, 8], sizes = [8, 1], strides = [1, 1]} : vector<8x36xf32> to vector<8x1xf32>
    %207 = vector.extract_strided_slice %205 {offsets = [0, 0], sizes = [1, 512], strides = [1, 1]} : vector<8x512xf32> to vector<1x512xf32>
    %208 = vector.broadcast %206 : vector<8x1xf32> to vector<8x512xf32>
    %209 = vector.broadcast %207 : vector<1x512xf32> to vector<8x512xf32>
    %210 = arith.mulf %208, %209 : vector<8x512xf32>
    %211 = arith.addf %204, %210 : vector<8x512xf32>
    %212 = vector.extract_strided_slice %1 {offsets = [0, 17], sizes = [8, 1], strides = [1, 1]} : vector<8x36xf32> to vector<8x1xf32>
    %213 = vector.extract_strided_slice %205 {offsets = [1, 0], sizes = [1, 512], strides = [1, 1]} : vector<8x512xf32> to vector<1x512xf32>
    %214 = vector.broadcast %212 : vector<8x1xf32> to vector<8x512xf32>
    %215 = vector.broadcast %213 : vector<1x512xf32> to vector<8x512xf32>
    %216 = arith.mulf %214, %215 : vector<8x512xf32>
    %217 = arith.addf %211, %216 : vector<8x512xf32>
    %218 = vector.extract_strided_slice %1 {offsets = [0, 26], sizes = [8, 1], strides = [1, 1]} : vector<8x36xf32> to vector<8x1xf32>
    %219 = vector.extract_strided_slice %205 {offsets = [2, 0], sizes = [1, 512], strides = [1, 1]} : vector<8x512xf32> to vector<1x512xf32>
    %220 = vector.broadcast %218 : vector<8x1xf32> to vector<8x512xf32>
    %221 = vector.broadcast %219 : vector<1x512xf32> to vector<8x512xf32>
    %222 = arith.mulf %220, %221 : vector<8x512xf32>
    %223 = arith.addf %217, %222 : vector<8x512xf32>
    %224 = vector.extract_strided_slice %1 {offsets = [0, 35], sizes = [8, 1], strides = [1, 1]} : vector<8x36xf32> to vector<8x1xf32>
    %225 = vector.extract_strided_slice %205 {offsets = [3, 0], sizes = [1, 512], strides = [1, 1]} : vector<8x512xf32> to vector<1x512xf32>
    %226 = vector.broadcast %224 : vector<8x1xf32> to vector<8x512xf32>
    %227 = vector.broadcast %225 : vector<1x512xf32> to vector<8x512xf32>
    %228 = arith.mulf %226, %227 : vector<8x512xf32>
    %229 = arith.addf %223, %228 : vector<8x512xf32>
    %cst = arith.constant 0.000000e+00 : f32
    %230 = vector.broadcast %cst : f32 to vector<8x512xf32>
    %231 = arith.maximumf %229, %230 : vector<8x512xf32>
    %c0_7 = arith.constant 0 : index
    %c0_8 = arith.constant 0 : index
    %232 = vector.load %arg4[%c0_7, %c0_8] : memref<8x1xf32, #tpu.memory_space<vmem>>, vector<8x1xf32>
    %233 = vector.shape_cast %232 : vector<8x1xf32> to vector<8x1xf32>
    %234 = vector.broadcast %233 : vector<8x1xf32> to vector<8x512xf32>
    %235 = vector.extract_strided_slice %2 {offsets = [0, 0], sizes = [8, 1], strides = [1, 1]} : vector<8x8xf32> to vector<8x1xf32>
    %236 = vector.extract_strided_slice %231 {offsets = [0, 0], sizes = [1, 512], strides = [1, 1]} : vector<8x512xf32> to vector<1x512xf32>
    %237 = vector.broadcast %235 : vector<8x1xf32> to vector<8x512xf32>
    %238 = vector.broadcast %236 : vector<1x512xf32> to vector<8x512xf32>
    %239 = arith.mulf %237, %238 : vector<8x512xf32>
    %240 = arith.addf %234, %239 : vector<8x512xf32>
    %241 = vector.extract_strided_slice %2 {offsets = [0, 1], sizes = [8, 1], strides = [1, 1]} : vector<8x8xf32> to vector<8x1xf32>
    %242 = vector.extract_strided_slice %231 {offsets = [1, 0], sizes = [1, 512], strides = [1, 1]} : vector<8x512xf32> to vector<1x512xf32>
    %243 = vector.broadcast %241 : vector<8x1xf32> to vector<8x512xf32>
    %244 = vector.broadcast %242 : vector<1x512xf32> to vector<8x512xf32>
    %245 = arith.mulf %243, %244 : vector<8x512xf32>
    %246 = arith.addf %240, %245 : vector<8x512xf32>
    %247 = vector.extract_strided_slice %2 {offsets = [0, 2], sizes = [8, 1], strides = [1, 1]} : vector<8x8xf32> to vector<8x1xf32>
    %248 = vector.extract_strided_slice %231 {offsets = [2, 0], sizes = [1, 512], strides = [1, 1]} : vector<8x512xf32> to vector<1x512xf32>
    %249 = vector.broadcast %247 : vector<8x1xf32> to vector<8x512xf32>
    %250 = vector.broadcast %248 : vector<1x512xf32> to vector<8x512xf32>
    %251 = arith.mulf %249, %250 : vector<8x512xf32>
    %252 = arith.addf %246, %251 : vector<8x512xf32>
    %253 = vector.extract_strided_slice %2 {offsets = [0, 3], sizes = [8, 1], strides = [1, 1]} : vector<8x8xf32> to vector<8x1xf32>
    %254 = vector.extract_strided_slice %231 {offsets = [3, 0], sizes = [1, 512], strides = [1, 1]} : vector<8x512xf32> to vector<1x512xf32>
    %255 = vector.broadcast %253 : vector<8x1xf32> to vector<8x512xf32>
    %256 = vector.broadcast %254 : vector<1x512xf32> to vector<8x512xf32>
    %257 = arith.mulf %255, %256 : vector<8x512xf32>
    %258 = arith.addf %252, %257 : vector<8x512xf32>
    %259 = vector.extract_strided_slice %2 {offsets = [0, 4], sizes = [8, 1], strides = [1, 1]} : vector<8x8xf32> to vector<8x1xf32>
    %260 = vector.extract_strided_slice %231 {offsets = [4, 0], sizes = [1, 512], strides = [1, 1]} : vector<8x512xf32> to vector<1x512xf32>
    %261 = vector.broadcast %259 : vector<8x1xf32> to vector<8x512xf32>
    %262 = vector.broadcast %260 : vector<1x512xf32> to vector<8x512xf32>
    %263 = arith.mulf %261, %262 : vector<8x512xf32>
    %264 = arith.addf %258, %263 : vector<8x512xf32>
    %265 = vector.extract_strided_slice %2 {offsets = [0, 5], sizes = [8, 1], strides = [1, 1]} : vector<8x8xf32> to vector<8x1xf32>
    %266 = vector.extract_strided_slice %231 {offsets = [5, 0], sizes = [1, 512], strides = [1, 1]} : vector<8x512xf32> to vector<1x512xf32>
    %267 = vector.broadcast %265 : vector<8x1xf32> to vector<8x512xf32>
    %268 = vector.broadcast %266 : vector<1x512xf32> to vector<8x512xf32>
    %269 = arith.mulf %267, %268 : vector<8x512xf32>
    %270 = arith.addf %264, %269 : vector<8x512xf32>
    %271 = vector.extract_strided_slice %2 {offsets = [0, 6], sizes = [8, 1], strides = [1, 1]} : vector<8x8xf32> to vector<8x1xf32>
    %272 = vector.extract_strided_slice %231 {offsets = [6, 0], sizes = [1, 512], strides = [1, 1]} : vector<8x512xf32> to vector<1x512xf32>
    %273 = vector.broadcast %271 : vector<8x1xf32> to vector<8x512xf32>
    %274 = vector.broadcast %272 : vector<1x512xf32> to vector<8x512xf32>
    %275 = arith.mulf %273, %274 : vector<8x512xf32>
    %276 = arith.addf %270, %275 : vector<8x512xf32>
    %277 = vector.extract_strided_slice %2 {offsets = [0, 7], sizes = [8, 1], strides = [1, 1]} : vector<8x8xf32> to vector<8x1xf32>
    %278 = vector.extract_strided_slice %231 {offsets = [7, 0], sizes = [1, 512], strides = [1, 1]} : vector<8x512xf32> to vector<1x512xf32>
    %279 = vector.broadcast %277 : vector<8x1xf32> to vector<8x512xf32>
    %280 = vector.broadcast %278 : vector<1x512xf32> to vector<8x512xf32>
    %281 = arith.mulf %279, %280 : vector<8x512xf32>
    %282 = arith.addf %276, %281 : vector<8x512xf32>
    %cst_9 = arith.constant 0.000000e+00 : f32
    %283 = vector.broadcast %cst_9 : f32 to vector<8x512xf32>
    %284 = arith.maximumf %282, %283 : vector<8x512xf32>
    %c0_10 = arith.constant 0 : index
    %c0_11 = arith.constant 0 : index
    %285 = vector.load %arg5[%c0_10, %c0_11] : memref<8x512xf32, #tpu.memory_space<vmem>>, vector<8x512xf32>
    tpu.vector_store %arg5[%c0_10, %c0_11], %284 {strides = array<i32>} : memref<8x512xf32, #tpu.memory_space<vmem>>, vector<8x512xf32>,
    return
  }
}

</mosaic_0001>

<bundles_post_ra>
// kernel: residual_block_3_3.1
= control target key start
LH: loop header
LB: loop body
LE: loop exit
PB: predicated region body
PF: predicated region fallthrough
CT: control target
= control target key end

     0   :  { %v1484_v0 = vmov 9   ;;  %v1485_v1 = vmov 0   ;;  %v1486_v4 = vmov 18   ;;  %v1487_v6 = vmov 27   ;;  %s1493_s29 = smov 126   ;;  %s1502_s30 = smov 111   ;;  %s2179_s2 = inlined_call_operand.vmem [shape: f32[8,1], index: 2, kind: input, shape index: {}]   ;;  %s2180_s1 = inlined_call_operand.vmem [shape: f32[8,36], index: 1, kind: input, shape index: {}]   ;;  %s2181_s0 = inlined_call_operand.vmem [shape: f32[8,512], index: 0, kind: input, shape index: {}]   ;;  %s2182_s3 = inlined_call_operand.vmem [shape: f32[8,8], index: 3, kind: input, shape index: {}]   ;;  %s2183_s4 = inlined_call_operand.vmem [shape: f32[8,1], index: 4, kind: input, shape index: {}]   ;;  %s2184_s5 = inlined_call_operand.vmem [shape: f32[8,512], index: 5, kind: output, shape index: {}]  }
   0x1   :  { %1439 = vset.pattern.permute.xlu1 %v1484_v0  ;;  %1438 = vset.pattern.permute.xlu0 %v1485_v1  ;;  %v26_v2 = vld [vmem:[%s2179_s2] sm:$0xff]  ;;  %v1580_v7 = vld [vmem:[%s2181_s0 + $0x10] sm:$0xff]  ;;  %v1585_v8 = vld [vmem:[%s2181_s0 + $0x8] sm:$0xff]  ;;  %v1489_v9 = vmov 10   ;;  %v1490_v10 = vmov 1   ;;  %v1491_v12 = vmov 28   ;;  %v37_v34 = vlaneseq }
   0x2   :  { %v1565_v3 = vld [vmem:[%s2180_s1] sm:$0xff]  ;;  %29 = vperm.xlu0 %1438, %v26_v2   ;;  %s1488_s1 = smov 127   ;;  %v1593_v11 = vld [vmem:[%s2181_s0 + $0x18] sm:$0xff]  ;;  %v1492_v13 = vmov 19   ;;  %v1494_v14 = vmov 2   ;;  %v1495_v15 = vmov 11  }
   0x3   :  { %62 = vperm.xlu1 %1439, %v1565_v3   ;;  %v1573_v5 = vld [vmem:[%s2181_s0] sm:$0xff]  ;;  %v1496_v16 = vmov 29   ;;  %s1497_s0 = smov 112   ;;  %v1498_v17 = vmov 3   ;;  %v1499_v18 = vmov 20   ;;  %v1500_v19 = vmov 30  }
   0x4   :  { %v1501_v20 = vmov 12   ;;  %v1503_v21 = vmov 4   ;;  %v1504_v22 = vmov 31   ;;  %s1505_s6 = smov 110   ;;  %v1506_v23 = vmov 5   ;;  %s1510_s7 = smov 96  }
   0x5   :  { %v1507_v24 = vmov 21   ;;  %v1508_v25 = vmov 13   ;;  %v1509_v26 = vmov 32   ;;  %v1511_v27 = vmov 24   ;;  %s1513_s8 = smov 95   ;;  %s1517_s9 = smov 94  }
   0x6   :  { %34 = vperm.xlu0 %1438, %v1565_v3   ;;  %v1512_v28 = vmov 22   ;;  %v1514_v29 = vmov 16   ;;  %v1515_v30 = vmov 14   ;;  %v1516_v31 = vmov 8   ;;  %v1657_v35 = vld [vmem:[%s2182_s3] sm:$0xff] }
   0x7   :  { %1440 = vset.pattern.permute.xlu1 %v1486_v4  ;;  %v1518_v32 = vmov 17   ;;  %v1519_v33 = vmov 23   ;;  %v1520_v36 = vmov 6   ;;  %v1663_v37 = vshrl.u32 %v37_v34, 7 }
   0x8   :  { %90 = vperm.xlu1 %1440, %v1565_v3   ;;  %v1521_v38 = vmov 15   ;;  %v1704_v55 = vand.u32 127, %v37_v34 }
   0x9   :  { %v1668_v39 = vsub.s32 0, %v1663_v37  ;;  %v1672_v40 = vsub.s32 1, %v1663_v37  ;;  %v1676_v41 = vsub.s32 2, %v1663_v37  ;;  %v1681_v44 = vsub.s32 3, %v1663_v37 }
   0xa   :  { %1441 = vset.pattern.permute.xlu0 %v1487_v6  ;;  %vm155_vm0 = vcmp.lt.s32.totalorder %v1704_v55, 127  ;;  %vm280_vm1 = vcmp.lt.s32.totalorder %v1704_v55, 126  ;;  %vm405_vm2 = vcmp.lt.s32.totalorder %v1704_v55, 112  ;;  %vm530_vm3 = vcmp.lt.s32.totalorder %v1704_v55, 111 }
   0xb   :  { %118 = vperm.xlu0 %1441, %v1565_v3   ;;  %v40_v45 = vrot.slane %v1573_v5, %v1668_v39  ;;  %v44_v46 = vrot.slane %v1585_v8, %v1668_v39  ;;  %v48_v47 = vrot.slane %v1580_v7, %v1668_v39  ;;  %v52_v48 = vrot.slane %v1593_v11, %v1668_v39 }
   0xc   :  { %145 = vrot.lane.b32.xlu1 %v1573_v5, %s1488_s1  ;;  %v68_v49 = vrot.slane %v1573_v5, %v1672_v40  ;;  %v72_v50 = vrot.slane %v1585_v8, %v1672_v40  ;;  %v76_v51 = vrot.slane %v1580_v7, %v1672_v40  ;;  %v80_v52 = vrot.slane %v1593_v11, %v1672_v40 }
   0xd   :  { %1443 = vset.pattern.permute.xlu1 %v1489_v9  ;;  %v96_v53 = vrot.slane %v1573_v5, %v1676_v41  ;;  %v100_v54 = vrot.slane %v1585_v8, %v1676_v41  ;;  %v104_v57 = vrot.slane %v1580_v7, %v1676_v41  ;;  %v108_v58 = vrot.slane %v1593_v11, %v1676_v41 }
   0xe   :  { %v124_v59 = vrot.slane %v1573_v5, %v1681_v44  ;;  %v128_v60 = vrot.slane %v1585_v8, %v1681_v44  ;;  %vm655_vm4 = vcmp.lt.s32.totalorder %v1704_v55, 110  ;;  %vm780_vm5 = vcmp.lt.s32.totalorder %v1704_v55, 96 }
   0xf   :  { %149 = vrot.lane.b32.xlu0 %v1580_v7, %s1488_s1  ;;  %vm905_vm6 = vcmp.lt.s32.totalorder %v1704_v55, 95  ;;  %vm1030_vm7 = vcmp.lt.s32.totalorder %v1704_v55, 94 }
  0x10   :  { %147 = vrot.lane.b32.xlu1 %v1585_v8, %s1488_s1  ;;  %1442 = vset.pattern.permute.xlu0 %v1490_v10 }
  0x13   :  { %161 = vperm.xlu0 %1442, %v1565_v3  }
  0x14   :  { %151 = vrot.lane.b32.xlu1 %v1593_v11, %s1488_s1 }
  0x17   :  { %1445 = vset.pattern.permute.xlu0 %v1491_v12 }
  0x18   :  { %189 = vperm.xlu1 %1443, %v1565_v3   ;;  %245 = vperm.xlu0 %1445, %v1565_v3  }
  0x1c   :  { %1444 = vset.pattern.permute.xlu1 %v1492_v13  ;;  %276 = vrot.lane.b32.xlu0 %v1580_v7, %s1493_s29 }
  0x1d   :  { %217 = vperm.xlu1 %1444, %v1565_v3   ;;  %1446 = vset.pattern.permute.xlu0 %v1494_v14 }
  0x20   :  { %286 = vperm.xlu0 %1446, %v1565_v3  }
  0x21   :  { %272 = vrot.lane.b32.xlu1 %v1573_v5, %s1493_s29 }
  0x22   :  { %1447 = vset.pattern.permute.xlu1 %v1495_v15 }
  0x24   :  { %1449 = vset.pattern.permute.xlu0 %v1496_v16 }
  0x25   :  { %274 = vrot.lane.b32.xlu1 %v1585_v8, %s1493_s29  ;;  %370 = vperm.xlu0 %1449, %v1565_v3  }
  0x29   :  { %278 = vrot.lane.b32.xlu1 %v1593_v11, %s1493_s29  ;;  %401 = vrot.lane.b32.xlu0 %v1580_v7, %s1497_s0 }
  0x2a   :  { %1450 = vset.pattern.permute.xlu0 %v1498_v17 }
  0x2d   :  { %314 = vperm.xlu1 %1447, %v1565_v3   ;;  %411 = vperm.xlu0 %1450, %v1565_v3  }
  0x31   :  { %1448 = vset.pattern.permute.xlu1 %v1499_v18  ;;  %1453 = vset.pattern.permute.xlu0 %v1500_v19  ;;  %v1522_v18 = vmov 7  }
  0x32   :  { %342 = vperm.xlu1 %1448, %v1565_v3   ;;  %495 = vperm.xlu0 %1453, %v1565_v3  }
  0x36   :  { %397 = vrot.lane.b32.xlu1 %v1573_v5, %s1497_s0  ;;  %526 = vrot.lane.b32.xlu0 %v1580_v7, %s1502_s30 }
  0x37   :  { %1451 = vset.pattern.permute.xlu1 %v1501_v20  ;;  %1454 = vset.pattern.permute.xlu0 %v1503_v21 }
  0x3a   :  { %399 = vrot.lane.b32.xlu1 %v1585_v8, %s1497_s0  ;;  %536 = vperm.xlu0 %1454, %v1565_v3  }
  0x3e   :  { %403 = vrot.lane.b32.xlu1 %v1593_v11, %s1497_s0  ;;  %1457 = vset.pattern.permute.xlu0 %v1504_v22 }
  0x3f   :  { %620 = vperm.xlu0 %1457, %v1565_v3  }
  0x42   :  { %439 = vperm.xlu1 %1451, %v1565_v3  }
  0x43   :  { %651 = vrot.lane.b32.xlu0 %v1580_v7, %s1505_s6 }
  0x44   :  { %1458 = vset.pattern.permute.xlu0 %v1506_v23 }
  0x46   :  { %1452 = vset.pattern.permute.xlu1 %v1507_v24  ;;  %v1523_v24 = vmov 33  }
  0x47   :  { %467 = vperm.xlu1 %1452, %v1565_v3   ;;  %661 = vperm.xlu0 %1458, %v1565_v3  }
  0x4b   :  { %522 = vrot.lane.b32.xlu1 %v1573_v5, %s1502_s30  ;;  %1461 = vset.pattern.permute.xlu0 %v1509_v26 }
  0x4c   :  { %1455 = vset.pattern.permute.xlu1 %v1508_v25  ;;  %745 = vperm.xlu0 %1461, %v1565_v3  }
  0x4f   :  { %524 = vrot.lane.b32.xlu1 %v1585_v8, %s1502_s30 }
  0x50   :  { %774 = vrot.lane.b32.xlu0 %v1585_v8, %s1510_s7 }
  0x51   :  { %1464 = vset.pattern.permute.xlu0 %v1511_v27 }
  0x53   :  { %528 = vrot.lane.b32.xlu1 %v1593_v11, %s1502_s30 }
  0x54   :  { %778 = vrot.lane.b32.xlu0 %v1593_v11, %s1510_s7 }
  0x57   :  { %564 = vperm.xlu1 %1455, %v1565_v3  }
  0x58   :  { %842 = vperm.xlu0 %1464, %v1565_v3  }
  0x5b   :  { %1456 = vset.pattern.permute.xlu1 %v1512_v28 }
  0x5c   :  { %592 = vperm.xlu1 %1456, %v1565_v3   ;;  %897 = vrot.lane.b32.xlu0 %v1573_v5, %s1513_s8 }
  0x5d   :  { %1467 = vset.pattern.permute.xlu0 %v1514_v29 }
  0x60   :  { %647 = vrot.lane.b32.xlu1 %v1573_v5, %s1505_s6  ;;  %901 = vrot.lane.b32.xlu0 %v1580_v7, %s1513_s8 }
  0x61   :  { %1459 = vset.pattern.permute.xlu1 %v1515_v30 }
  0x64   :  { %649 = vrot.lane.b32.xlu1 %v1585_v8, %s1505_s6  ;;  %939 = vperm.xlu0 %1467, %v1565_v3  }
  0x68   :  { %653 = vrot.lane.b32.xlu1 %v1593_v11, %s1505_s6  ;;  %1470 = vset.pattern.permute.xlu0 %v1516_v31 }
  0x69   :  { %1036 = vperm.xlu0 %1470, %v1565_v3  }
  0x6c   :  { %689 = vperm.xlu1 %1459, %v1565_v3  }
  0x6d   :  { %1026 = vrot.lane.b32.xlu0 %v1580_v7, %s1517_s9 }
  0x6e   :  { %1471 = vset.pattern.permute.xlu0 %v1518_v32 }
  0x70   :  { %1460 = vset.pattern.permute.xlu1 %v1519_v33 }
  0x71   :  { %717 = vperm.xlu1 %1460, %v1565_v3   ;;  %1064 = vperm.xlu0 %1471, %v1565_v3  }
  0x75   :  { %1462 = vset.pattern.permute.xlu1 %v1520_v36  ;;  %1474 = vset.pattern.permute.xlu0 %v1485_v1 }
  0x76   :  { %786 = vperm.xlu1 %1462, %v1565_v3   ;;  %1159 = vperm.xlu0 %1474, %v1657_v35  }
  0x7a   :  { %772 = vrot.lane.b32.xlu1 %v1573_v5, %s1510_s7  ;;  %1477 = vset.pattern.permute.xlu0 %v1494_v14 }
  0x7b   :  { %1463 = vset.pattern.permute.xlu1 %v1521_v38  ;;  %1215 = vperm.xlu0 %1477, %v1657_v35   ;;  %v132_v38 = vrot.slane %v1580_v7, %v1681_v44 }
  0x7d   :  { %v30_v42 = vpop.permute.xlu0 %29 }
  0x7e   :  { %v63_v43 = vpop.permute.xlu1 %62  ;;  %776 = vrot.lane.b32.xlu1 %v1580_v7, %s1510_s7 }
  0x7f   :  { %1480 = vset.pattern.permute.xlu0 %v1506_v23  ;;  %v81_v4 = vmul.f32 %v68_v49, %v63_v43  ;;  %v82_v6 = vmul.f32 %v72_v50, %v63_v43  ;;  %v83_v9 = vmul.f32 %v76_v51, %v63_v43  ;;  %v84_v12 = vmul.f32 %v80_v52, %v63_v43 }
  0x80   :  { %1299 = vperm.xlu0 %1480, %v1657_v35  }
  0x81   :  { %v35_v56 = vpop.permute.xlu0 %34 }
  0x82   :  { %814 = vperm.xlu1 %1463, %v1565_v3   ;;  %v53_v61 = vmul.f32 %v40_v45, %v35_v56  ;;  %v54_v62 = vmul.f32 %v44_v46, %v35_v56  ;;  %v55_v63 = vmul.f32 %v48_v47, %v35_v56  ;;  %v56_v0 = vmul.f32 %v52_v48, %v35_v56 }
  0x83   :  { %v91_v2 = vpop.permute.xlu1 %90 }
  0x84   :  { %v57_v13 = vadd.f32 %v53_v61, %v30_v42  ;;  %v58_v14 = vadd.f32 %v54_v62, %v30_v42  ;;  %v59_v15 = vadd.f32 %v55_v63, %v30_v42  ;;  %v60_v16 = vadd.f32 %v56_v0, %v30_v42  ;;  %1483 = vset.pattern.permute.xlu0 %v1522_v18 }
  0x85   :  { %v109_v19 = vmul.f32 %v96_v53, %v91_v2  ;;  %v110_v20 = vmul.f32 %v100_v54, %v91_v2  ;;  %v111_v22 = vmul.f32 %v104_v57, %v91_v2  ;;  %v112_v23 = vmul.f32 %v108_v58, %v91_v2 }
  0x86   :  { %1465 = vset.pattern.permute.xlu1 %v1523_v24  ;;  %v85_v25 = vadd.f32 %v81_v4, %v57_v13  ;;  %v86_v26 = vadd.f32 %v82_v6, %v58_v14  ;;  %v87_v27 = vadd.f32 %v83_v9, %v59_v15  ;;  %v88_v28 = vadd.f32 %v84_v12, %v60_v16  ;;  %v119_v29 = vpop.permute.xlu0 %118 }
  0x87   :  { %870 = vperm.xlu1 %1465, %v1565_v3   ;;  %v146_v30 = vpop.permute.xlu1 %145  ;;  %v136_v42 = vrot.slane %v1593_v11, %v1681_v44  ;;  %v137_v43 = vmul.f32 %v124_v59, %v119_v29  ;;  %v138_v45 = vmul.f32 %v128_v60, %v119_v29  ;;  %v139_v51 = vmul.f32 %v132_v38, %v119_v29 }
  0x88   :  { %v113_v31 = vadd.f32 %v109_v19, %v85_v25  ;;  %v114_v32 = vadd.f32 %v110_v20, %v86_v26  ;;  %v115_v33 = vadd.f32 %v111_v22, %v87_v27  ;;  %v116_v34 = vadd.f32 %v112_v23, %v88_v28 }
  0x89   :  { %v140_v52 = vmul.f32 %v136_v42, %v119_v29  ;;  %v1524_v4 = vmov 25  }
  0x8a   :  { %v150_v46 = vpop.permute.xlu0 %149  ;;  %v141_v53 = vadd.f32 %v137_v43, %v113_v31  ;;  %v142_v54 = vadd.f32 %v138_v45, %v114_v32  ;;  %v143_v14 = vadd.f32 %v139_v51, %v115_v33 }
  0x8b   :  { %1466 = vset.pattern.permute.xlu1 %v1522_v18  ;;  %v148_v47 = vpop.permute.xlu1 %147  ;;  %v144_v15 = vadd.f32 %v140_v52, %v116_v34 }
  0x8c   :  { %v157_v48 = vsel %vm155_vm0, %v148_v47, %v150_v46  ;;  %v158_v49 = vsel %vm155_vm0, %v146_v30, %v148_v47  ;;  %911 = vperm.xlu1 %1466, %v1565_v3  }
  0x8d   :  { %v167_v50 = vrot.slane %v158_v49, %v1668_v39  ;;  %v171_v7 = vrot.slane %v157_v48, %v1668_v39  ;;  %v195_v6 = vrot.slane %v158_v49, %v1672_v40  ;;  %v199_v9 = vrot.slane %v157_v48, %v1672_v40 }
  0x8e   :  { %v162_v56 = vpop.permute.xlu0 %161  ;;  %v223_v28 = vrot.slane %v158_v49, %v1676_v41  ;;  %v227_v29 = vrot.slane %v157_v48, %v1676_v41  ;;  %v251_v43 = vrot.slane %v158_v49, %v1681_v44  ;;  %v255_v45 = vrot.slane %v157_v48, %v1681_v44 }
  0x8f   :  { %v152_v57 = vpop.permute.xlu1 %151  ;;  %v180_v58 = vmul.f32 %v167_v50, %v162_v56  ;;  %v181_v59 = vmul.f32 %v171_v7, %v162_v56  ;;  %v1525_v48 = vmov 34  }
  0x90   :  { %v156_v60 = vsel %vm155_vm0, %v150_v46, %v152_v57  ;;  %v159_v61 = vsel %vm155_vm0, %v152_v57, %v146_v30  ;;  %899 = vrot.lane.b32.xlu1 %v1585_v8, %s1513_s8 }
  0x91   :  { %v175_v62 = vrot.slane %v156_v60, %v1668_v39  ;;  %v179_v63 = vrot.slane %v159_v61, %v1668_v39  ;;  %v203_v0 = vrot.slane %v156_v60, %v1672_v40  ;;  %v207_v2 = vrot.slane %v159_v61, %v1672_v40  ;;  %1468 = vset.pattern.permute.xlu1 %v1524_v4 }
  0x92   :  { %v184_v12 = vadd.f32 %v180_v58, %v141_v53  ;;  %v185_v13 = vadd.f32 %v181_v59, %v142_v54  ;;  %v231_v32 = vrot.slane %v156_v60, %v1676_v41  ;;  %v235_v33 = vrot.slane %v159_v61, %v1676_v41 }
  0x93   :  { %v182_v16 = vmul.f32 %v175_v62, %v162_v56  ;;  %v183_v19 = vmul.f32 %v179_v63, %v162_v56  ;;  %v190_v20 = vpop.permute.xlu1 %189  ;;  %v246_v42 = vpop.permute.xlu0 %245  ;;  %v259_v46 = vrot.slane %v156_v60, %v1681_v44  ;;  %v263_v47 = vrot.slane %v159_v61, %v1681_v44 }
  0x94   :  { %v208_v22 = vmul.f32 %v195_v6, %v190_v20  ;;  %v209_v23 = vmul.f32 %v199_v9, %v190_v20  ;;  %v210_v24 = vmul.f32 %v203_v0, %v190_v20  ;;  %v211_v25 = vmul.f32 %v207_v2, %v190_v20  ;;  %903 = vrot.lane.b32.xlu1 %v1593_v11, %s1513_s8 }
  0x95   :  { %v186_v26 = vadd.f32 %v182_v16, %v143_v14  ;;  %v187_v27 = vadd.f32 %v183_v19, %v144_v15  ;;  %v264_v54 = vmul.f32 %v251_v43, %v246_v42  ;;  %v265_v56 = vmul.f32 %v255_v45, %v246_v42 }
  0x96   :  { %v212_v30 = vadd.f32 %v208_v22, %v184_v12  ;;  %v213_v31 = vadd.f32 %v209_v23, %v185_v13  ;;  %v266_v57 = vmul.f32 %v259_v46, %v246_v42  ;;  %v267_v58 = vmul.f32 %v263_v47, %v246_v42 }
  0x97   :  { %v214_v34 = vadd.f32 %v210_v24, %v186_v26  ;;  %v215_v38 = vadd.f32 %v211_v25, %v187_v27  ;;  %v277_v6 = vpop.permute.xlu0 %276  ;;  %v1526_v16 = vmov 26  }
  0x98   :  { %967 = vperm.xlu1 %1468, %v1565_v3   ;;  %v218_v50 = vpop.permute.xlu1 %217 }
  0x99   :  { %v236_v7 = vmul.f32 %v223_v28, %v218_v50  ;;  %v237_v51 = vmul.f32 %v227_v29, %v218_v50  ;;  %v238_v52 = vmul.f32 %v231_v32, %v218_v50  ;;  %v239_v53 = vmul.f32 %v235_v33, %v218_v50 }
  0x9b   :  { %v240_v59 = vadd.f32 %v236_v7, %v212_v30  ;;  %v241_v62 = vadd.f32 %v237_v51, %v213_v31  ;;  %v242_v49 = vadd.f32 %v238_v52, %v214_v34  ;;  %v243_v63 = vadd.f32 %v239_v53, %v215_v38  ;;  %v287_v19 = vpop.permute.xlu0 %286 }
  0x9c   :  { %1469 = vset.pattern.permute.xlu1 %v1525_v48  ;;  %v273_v60 = vpop.permute.xlu1 %272 }
  0x9d   :  { %v268_v0 = vadd.f32 %v264_v54, %v240_v59  ;;  %v269_v61 = vadd.f32 %v265_v56, %v241_v62  ;;  %v270_v2 = vadd.f32 %v266_v57, %v242_v49  ;;  %v271_v4 = vadd.f32 %v267_v58, %v243_v63  ;;  %995 = vperm.xlu1 %1469, %v1565_v3  }
  0xa0   :  { %v275_v9 = vpop.permute.xlu1 %274  ;;  %v371_v58 = vpop.permute.xlu0 %370 }
  0xa1   :  { %v282_v12 = vsel %vm280_vm1, %v275_v9, %v277_v6  ;;  %v283_v13 = vsel %vm280_vm1, %v273_v60, %v275_v9  ;;  %1022 = vrot.lane.b32.xlu1 %v1573_v5, %s1517_s9 }
  0xa2   :  { %v292_v14 = vrot.slane %v283_v13, %v1668_v39  ;;  %v296_v15 = vrot.slane %v282_v12, %v1668_v39  ;;  %1472 = vset.pattern.permute.xlu1 %v1526_v16  ;;  %v320_v29 = vrot.slane %v283_v13, %v1672_v40  ;;  %v324_v30 = vrot.slane %v282_v12, %v1672_v40 }
  0xa3   :  { %v348_v31 = vrot.slane %v283_v13, %v1676_v41  ;;  %v352_v32 = vrot.slane %v282_v12, %v1676_v41  ;;  %v376_v43 = vrot.slane %v283_v13, %v1681_v44  ;;  %v380_v45 = vrot.slane %v282_v12, %v1681_v44 }
  0xa4   :  { %v305_v20 = vmul.f32 %v292_v14, %v287_v19  ;;  %v306_v22 = vmul.f32 %v296_v15, %v287_v19  ;;  %v279_v23 = vpop.permute.xlu1 %278  ;;  %v1527_v16 = vmov 35  }
  0xa5   :  { %v281_v24 = vsel %vm280_vm1, %v277_v6, %v279_v23  ;;  %v284_v25 = vsel %vm280_vm1, %v279_v23, %v273_v60  ;;  %1024 = vrot.lane.b32.xlu1 %v1585_v8, %s1517_s9 }
  0xa6   :  { %v300_v26 = vrot.slane %v281_v24, %v1668_v39  ;;  %v304_v27 = vrot.slane %v284_v25, %v1668_v39  ;;  %v328_v5 = vrot.slane %v281_v24, %v1672_v40  ;;  %v332_v28 = vrot.slane %v284_v25, %v1672_v40 }
  0xa7   :  { %v310_v38 = vadd.f32 %v306_v22, %v269_v61  ;;  %v309_v42 = vadd.f32 %v305_v20, %v268_v0  ;;  %v384_v53 = vrot.slane %v281_v24, %v1681_v44  ;;  %v388_v54 = vrot.slane %v284_v25, %v1681_v44 }
  0xa8   :  { %v307_v33 = vmul.f32 %v300_v26, %v287_v19  ;;  %v308_v34 = vmul.f32 %v304_v27, %v287_v19  ;;  %v315_v8 = vpop.permute.xlu1 %314  ;;  %v356_v59 = vrot.slane %v281_v24, %v1676_v41  ;;  %v360_v62 = vrot.slane %v284_v25, %v1676_v41  ;;  %v1781_v25 = vpop.permute.xlu0 %401  ;;  %v1151_v26 = vld [vmem:[%s2183_s4] sm:$0xff] }
  0xa9   :  { %v333_v46 = vmul.f32 %v320_v29, %v315_v8  ;;  %v334_v47 = vmul.f32 %v324_v30, %v315_v8  ;;  %1028 = vrot.lane.b32.xlu1 %v1593_v11, %s1517_s9  ;;  %v335_v51 = vmul.f32 %v328_v5, %v315_v8  ;;  %v336_v52 = vmul.f32 %v332_v28, %v315_v8 }
  0xaa   :  { %v311_v50 = vadd.f32 %v307_v33, %v270_v2  ;;  %v312_v7 = vadd.f32 %v308_v34, %v271_v4  ;;  %v389_v2 = vmul.f32 %v376_v43, %v371_v58  ;;  %v390_v4 = vmul.f32 %v380_v45, %v371_v58 }
  0xab   :  { %v337_v56 = vadd.f32 %v333_v46, %v309_v42  ;;  %v338_v57 = vadd.f32 %v334_v47, %v310_v38  ;;  %v391_v6 = vmul.f32 %v384_v53, %v371_v58  ;;  %v392_v9 = vmul.f32 %v388_v54, %v371_v58 }
  0xac   :  { %v339_v49 = vadd.f32 %v335_v51, %v311_v50  ;;  %v340_v63 = vadd.f32 %v336_v52, %v312_v7  ;;  %v412_v30 = vpop.permute.xlu0 %411 }
  0xad   :  { %1092 = vperm.xlu1 %1472, %v1565_v3   ;;  %v343_v11 = vpop.permute.xlu1 %342 }
  0xae   :  { %v361_v48 = vmul.f32 %v348_v31, %v343_v11  ;;  %v362_v60 = vmul.f32 %v352_v32, %v343_v11  ;;  %v363_v0 = vmul.f32 %v356_v59, %v343_v11  ;;  %v364_v61 = vmul.f32 %v360_v62, %v343_v11 }
  0xb0   :  { %v365_v12 = vadd.f32 %v361_v48, %v337_v56  ;;  %v366_v13 = vadd.f32 %v362_v60, %v338_v57  ;;  %v367_v14 = vadd.f32 %v363_v0, %v339_v49  ;;  %v368_v15 = vadd.f32 %v364_v61, %v340_v63  ;;  %v496_v59 = vpop.permute.xlu0 %495 }
  0xb1   :  { %1473 = vset.pattern.permute.xlu1 %v1527_v16  ;;  %v398_v19 = vpop.permute.xlu1 %397 }
  0xb2   :  { %v393_v20 = vadd.f32 %v389_v2, %v365_v12  ;;  %v394_v22 = vadd.f32 %v390_v4, %v366_v13  ;;  %v1779_v23 = vadd.f32 %v391_v6, %v367_v14  ;;  %v396_v24 = vadd.f32 %v392_v9, %v368_v15  ;;  %1120 = vperm.xlu1 %1473, %v1565_v3  }
  0xb5   :  { %v400_v27 = vpop.permute.xlu1 %399 }
  0xb6   :  { %v407_v5 = vsel %vm405_vm2, %v400_v27, %v1781_v25  ;;  %v408_v28 = vsel %vm405_vm2, %v398_v19, %v400_v27  ;;  %1475 = vset.pattern.permute.xlu1 %v1485_v1 }
  0xb7   :  { %v417_v29 = vrot.slane %v408_v28, %v1668_v39  ;;  %v421_v3 = vrot.slane %v407_v5, %v1668_v39  ;;  %1154 = vperm.xlu1 %1475, %v1151_v26   ;;  %v445_v1 = vrot.slane %v408_v28, %v1672_v40  ;;  %v449_v42 = vrot.slane %v407_v5, %v1672_v40 }
  0xb8   :  { %v473_v51 = vrot.slane %v408_v28, %v1676_v41  ;;  %v501_v54 = vrot.slane %v408_v28, %v1681_v44  ;;  %v477_v58 = vrot.slane %v407_v5, %v1676_v41 }
  0xb9   :  { %v430_v31 = vmul.f32 %v417_v29, %v412_v30  ;;  %v431_v32 = vmul.f32 %v421_v3, %v412_v30  ;;  %v404_v33 = vpop.permute.xlu1 %403 }
  0xba   :  { %v409_v34 = vsel %vm405_vm2, %v404_v33, %v398_v19  ;;  %v514_v61 = vmul.f32 %v501_v54, %v496_v59 }
  0xbb   :  { %v429_v38 = vrot.slane %v409_v34, %v1668_v39  ;;  %v457_v8 = vrot.slane %v409_v34, %v1672_v40  ;;  %1476 = vset.pattern.permute.xlu1 %v1490_v10  ;;  %v435_v45 = vadd.f32 %v431_v32, %v394_v22  ;;  %v434_v47 = vadd.f32 %v430_v31, %v393_v20 }
  0xbc   :  { %1187 = vperm.xlu1 %1476, %v1657_v35   ;;  %v505_v10 = vrot.slane %v407_v5, %v1681_v44  ;;  %v485_v62 = vrot.slane %v409_v34, %v1676_v41  ;;  %v513_v49 = vrot.slane %v409_v34, %v1681_v44 }
  0xbd   :  { %v433_v43 = vmul.f32 %v429_v38, %v412_v30  ;;  %v440_v46 = vpop.permute.xlu1 %439 }
  0xbe   :  { %v458_v50 = vmul.f32 %v445_v1, %v440_v46  ;;  %v459_v7 = vmul.f32 %v449_v42, %v440_v46  ;;  %v461_v53 = vmul.f32 %v457_v8, %v440_v46  ;;  %v515_v2 = vmul.f32 %v505_v10, %v496_v59 }
  0xbf   :  { %v437_v52 = vadd.f32 %v433_v43, %v396_v24  ;;  %v517_v4 = vmul.f32 %v513_v49, %v496_v59  ;;  %v406_v24 = vsel %vm405_vm2, %v1781_v25, %v404_v33 }
  0xc0   :  { %v462_v56 = vadd.f32 %v458_v50, %v434_v47  ;;  %v463_v57 = vadd.f32 %v459_v7, %v435_v45  ;;  %1478 = vset.pattern.permute.xlu1 %v1498_v17  ;;  %v481_v3 = vrot.slane %v406_v24, %v1676_v41  ;;  %v509_v42 = vrot.slane %v406_v24, %v1681_v44 }
  0xc1   :  { %v465_v63 = vadd.f32 %v461_v53, %v437_v52  ;;  %1243 = vperm.xlu1 %1478, %v1657_v35  }
  0xc2   :  { %v468_v11 = vpop.permute.xlu1 %467 }
  0xc3   :  { %v486_v48 = vmul.f32 %v473_v51, %v468_v11  ;;  %v487_v60 = vmul.f32 %v477_v58, %v468_v11  ;;  %v489_v0 = vmul.f32 %v485_v62, %v468_v11  ;;  %v488_v38 = vmul.f32 %v481_v3, %v468_v11 }
  0xc4   :  { %v516_v51 = vmul.f32 %v509_v42, %v496_v59 }
  0xc5   :  { %v490_v6 = vadd.f32 %v486_v48, %v462_v56  ;;  %v491_v9 = vadd.f32 %v487_v60, %v463_v57  ;;  %v493_v17 = vadd.f32 %v489_v0, %v465_v63  ;;  %1479 = vset.pattern.permute.xlu1 %v1503_v21  ;;  %v527_v21 = vpop.permute.xlu0 %526 }
  0xc6   :  { %1271 = vperm.xlu1 %1479, %v1657_v35   ;;  %v523_v12 = vpop.permute.xlu1 %522 }
  0xc7   :  { %v518_v13 = vadd.f32 %v514_v61, %v490_v6  ;;  %v1814_v14 = vadd.f32 %v515_v2, %v491_v9  ;;  %v1816_v15 = vadd.f32 %v517_v4, %v493_v17 }
  0xc9   :  { %v537_v26 = vpop.permute.xlu0 %536 }
  0xca   :  { %1481 = vset.pattern.permute.xlu1 %v1520_v36  ;;  %v525_v16 = vpop.permute.xlu1 %524  ;;  %v425_v36 = vrot.slane %v406_v24, %v1668_v39 }
  0xcb   :  { %1327 = vperm.xlu1 %1481, %v1657_v35   ;;  %v533_v33 = vsel %vm530_vm3, %v523_v12, %v525_v16  ;;  %v1840_v8 = vsel %vm530_vm3, %v525_v16, %v527_v21 }
  0xcc   :  { %v432_v28 = vmul.f32 %v425_v36, %v412_v30  ;;  %v542_v45 = vrot.slane %v533_v33, %v1668_v39  ;;  %v570_v54 = vrot.slane %v533_v33, %v1672_v40  ;;  %v574_v58 = vrot.slane %v1840_v8, %v1672_v40 }
  0xcd   :  { %v1833_v29 = vpop.permute.xlu0 %620  ;;  %v598_v63 = vrot.slane %v533_v33, %v1676_v41  ;;  %v602_v11 = vrot.slane %v1840_v8, %v1676_v41  ;;  %v626_v60 = vrot.slane %v533_v33, %v1681_v44  ;;  %v630_v36 = vrot.slane %v1840_v8, %v1681_v44 }
  0xce   :  { %v529_v19 = vpop.permute.xlu1 %528  ;;  %v436_v31 = vadd.f32 %v432_v28, %v1779_v23  ;;  %v555_v53 = vmul.f32 %v542_v45, %v537_v26 }
  0xcf   :  { %1482 = vset.pattern.permute.xlu1 %v1522_v18  ;;  %v453_v18 = vrot.slane %v406_v24, %v1672_v40  ;;  %v1838_v34 = vsel %vm530_vm3, %v527_v21, %v529_v19  ;;  %v1842_v30 = vsel %vm530_vm3, %v529_v19, %v523_v12  ;;  %v639_v42 = vmul.f32 %v626_v60, %v1833_v29 }
  0xd0   :  { %1355 = vperm.xlu1 %1482, %v1657_v35   ;;  %v550_v23 = vrot.slane %v1838_v34, %v1668_v39  ;;  %v554_v47 = vrot.slane %v1842_v30, %v1668_v39  ;;  %v578_v56 = vrot.slane %v1838_v34, %v1672_v40  ;;  %v582_v49 = vrot.slane %v1842_v30, %v1672_v40 }
  0xd1   :  { %v460_v25 = vmul.f32 %v453_v18, %v440_v46  ;;  %v652_v32 = vpop.permute.xlu0 %651  ;;  %v546_v46 = vrot.slane %v1840_v8, %v1668_v39  ;;  %v606_v0 = vrot.slane %v1838_v34, %v1676_v41  ;;  %v610_v61 = vrot.slane %v1842_v30, %v1676_v41 }
  0xd2   :  { %v565_v20 = vpop.permute.xlu1 %564  ;;  %v557_v10 = vmul.f32 %v550_v23, %v537_v26  ;;  %v558_v62 = vmul.f32 %v554_v47, %v537_v26  ;;  %v559_v6 = vadd.f32 %v555_v53, %v518_v13 }
  0xd3   :  { %v464_v43 = vadd.f32 %v460_v25, %v436_v31  ;;  %v556_v57 = vmul.f32 %v546_v46, %v537_v26  ;;  %v583_v48 = vmul.f32 %v570_v54, %v565_v20  ;;  %v584_v2 = vmul.f32 %v574_v58, %v565_v20 }
  0xd4   :  { %v585_v9 = vmul.f32 %v578_v56, %v565_v20  ;;  %v562_v21 = vadd.f32 %v558_v62, %v1816_v15  ;;  %v586_v24 = vmul.f32 %v582_v49, %v565_v20  ;;  %v634_v20 = vrot.slane %v1838_v34, %v1681_v44 }
  0xd5   :  { %v492_v50 = vadd.f32 %v488_v38, %v464_v43  ;;  %v1854_v7 = vpop.permute.xlu0 %661  ;;  %v560_v19 = vadd.f32 %v556_v57, %v1814_v14  ;;  %v587_v28 = vadd.f32 %v583_v48, %v559_v6  ;;  %v638_v25 = vrot.slane %v1842_v30, %v1681_v44 }
  0xd6   :  { %v590_v43 = vadd.f32 %v586_v24, %v562_v21  ;;  %v640_v46 = vmul.f32 %v630_v36, %v1833_v29 }
  0xd7   :  { %v1822_v22 = vpop.permute.xlu1 %592  ;;  %v520_v59 = vadd.f32 %v516_v51, %v492_v50  ;;  %v588_v3 = vadd.f32 %v584_v2, %v560_v19  ;;  %v641_v50 = vmul.f32 %v634_v20, %v1833_v29  ;;  %v642_v51 = vmul.f32 %v638_v25, %v1833_v29 }
  0xd8   :  { %v611_v17 = vmul.f32 %v598_v63, %v1822_v22  ;;  %v612_v26 = vmul.f32 %v602_v11, %v1822_v22  ;;  %v613_v13 = vmul.f32 %v606_v0, %v1822_v22  ;;  %v614_v31 = vmul.f32 %v610_v61, %v1822_v22 }
  0xd9   :  { %v561_v4 = vadd.f32 %v557_v10, %v520_v59  ;;  %v1875_v12 = vpop.permute.xlu0 %745 }
  0xda   :  { %v615_v38 = vadd.f32 %v611_v17, %v587_v28  ;;  %v618_v47 = vadd.f32 %v614_v31, %v590_v43 }
  0xdb   :  { %v1827_v27 = vpop.permute.xlu1 %647  ;;  %v589_v33 = vadd.f32 %v585_v9, %v561_v4 }
  0xdc   :  { %v643_v53 = vadd.f32 %v639_v42, %v615_v38  ;;  %v646_v59 = vadd.f32 %v642_v51, %v618_v47 }
  0xdd   :  { %v775_v8 = vpop.permute.xlu0 %774  ;;  %v617_v23 = vadd.f32 %v613_v13, %v589_v33 }
  0xdf   :  { %v1830_v5 = vpop.permute.xlu1 %649  ;;  %v645_v57 = vadd.f32 %v641_v50, %v617_v23 }
  0xe0   :  { %v1893_v14 = vsel %vm655_vm4, %v1830_v5, %v652_v32 }
  0xe1   :  { %v671_v34 = vrot.slane %v1893_v14, %v1668_v39  ;;  %v699_v62 = vrot.slane %v1893_v14, %v1672_v40  ;;  %v779_v49 = vpop.permute.xlu0 %778  ;;  %v727_v60 = vrot.slane %v1893_v14, %v1676_v41  ;;  %v755_v61 = vrot.slane %v1893_v14, %v1681_v44 }
  0xe3   :  { %v654_v35 = vpop.permute.xlu1 %653  ;;  %v681_v58 = vmul.f32 %v671_v34, %v1854_v7  ;;  %v765_v47 = vmul.f32 %v755_v61, %v1875_v12 }
  0xe4   :  { %v1887_v18 = vsel %vm655_vm4, %v652_v32, %v654_v35  ;;  %v1898_v15 = vsel %vm655_vm4, %v654_v35, %v1827_v27  ;;  %v616_v32 = vadd.f32 %v612_v26, %v588_v3  ;;  %v658_v35 = vsel %vm655_vm4, %v1827_v27, %v1830_v5 }
  0xe5   :  { %v675_v45 = vrot.slane %v1887_v18, %v1668_v39  ;;  %v679_v30 = vrot.slane %v1898_v15, %v1668_v39  ;;  %v667_v27 = vrot.slane %v658_v35, %v1668_v39  ;;  %v703_v56 = vrot.slane %v1887_v18, %v1672_v40  ;;  %v1961_v33 = vpop.permute.xlu0 %842 }
  0xe6   :  { %v644_v10 = vadd.f32 %v640_v46, %v616_v32  ;;  %v695_v63 = vrot.slane %v658_v35, %v1672_v40  ;;  %v723_v11 = vrot.slane %v658_v35, %v1676_v41  ;;  %v707_v48 = vrot.slane %v1898_v15, %v1672_v40 }
  0xe7   :  { %v1844_v1 = vpop.permute.xlu1 %689  ;;  %v682_v5 = vmul.f32 %v675_v45, %v1854_v7  ;;  %v683_v29 = vmul.f32 %v679_v30, %v1854_v7  ;;  %v751_v0 = vrot.slane %v658_v35, %v1681_v44  ;;  %v680_v6 = vmul.f32 %v667_v27, %v1854_v7 }
  0xe8   :  { %v709_v2 = vmul.f32 %v699_v62, %v1844_v1  ;;  %v731_v9 = vrot.slane %v1887_v18, %v1676_v41  ;;  %v710_v19 = vmul.f32 %v703_v56, %v1844_v1  ;;  %v735_v21 = vrot.slane %v1898_v15, %v1676_v41 }
  0xe9   :  { %v686_v17 = vadd.f32 %v682_v5, %v645_v57  ;;  %v685_v24 = vadd.f32 %v681_v58, %v644_v10  ;;  %v687_v26 = vadd.f32 %v683_v29, %v646_v59  ;;  %v711_v28 = vmul.f32 %v707_v48, %v1844_v1 }
  0xea   :  { %v759_v31 = vrot.slane %v1887_v18, %v1681_v44  ;;  %v708_v14 = vmul.f32 %v695_v63, %v1844_v1  ;;  %v763_v1 = vrot.slane %v1898_v15, %v1681_v44  ;;  %v684_v45 = vadd.f32 %v680_v6, %v643_v53 }
  0xeb   :  { %v713_v20 = vadd.f32 %v709_v2, %v685_v24  ;;  %v714_v38 = vadd.f32 %v710_v19, %v686_v17  ;;  %v715_v34 = vadd.f32 %v711_v28, %v687_v26  ;;  %v764_v46 = vmul.f32 %v751_v0, %v1875_v12 }
  0xec   :  { %v1857_v52 = vpop.permute.xlu1 %717  ;;  %v712_v50 = vadd.f32 %v708_v14, %v684_v45  ;;  %v766_v51 = vmul.f32 %v759_v31, %v1875_v12  ;;  %v767_v27 = vmul.f32 %v763_v1, %v1875_v12 }
  0xed   :  { %v737_v13 = vmul.f32 %v727_v60, %v1857_v52  ;;  %v738_v7 = vmul.f32 %v731_v9, %v1857_v52  ;;  %v739_v42 = vmul.f32 %v735_v21, %v1857_v52  ;;  %v736_v23 = vmul.f32 %v723_v11, %v1857_v52  ;;  %v898_v52 = vpop.permute.xlu0 %897 }
  0xef   :  { %v741_v30 = vadd.f32 %v737_v13, %v713_v20  ;;  %v743_v53 = vadd.f32 %v739_v42, %v715_v34  ;;  %v740_v5 = vadd.f32 %v736_v23, %v712_v50 }
  0xf1   :  { %v1877_v16 = vpop.permute.xlu1 %786  ;;  %v769_v62 = vadd.f32 %v765_v47, %v741_v30  ;;  %v771_v60 = vadd.f32 %v767_v27, %v743_v53  ;;  %v768_v6 = vadd.f32 %v764_v46, %v740_v5  ;;  %v902_v21 = vpop.permute.xlu0 %901 }
  0xf5   :  { %v773_v22 = vpop.permute.xlu1 %772  ;;  %v940_v27 = vpop.permute.xlu0 %939 }
  0xf6   :  { %v1959_v25 = vsel %vm780_vm5, %v779_v49, %v773_v22  ;;  %v1966_v43 = vsel %vm780_vm5, %v773_v22, %v775_v8 }
  0xf7   :  { %v804_v22 = vrot.slane %v1959_v25, %v1668_v39  ;;  %v792_v15 = vrot.slane %v1966_v43, %v1668_v39  ;;  %v832_v59 = vrot.slane %v1959_v25, %v1672_v40  ;;  %v820_v11 = vrot.slane %v1966_v43, %v1672_v40 }
  0xf8   :  { %v848_v12 = vrot.slane %v1966_v43, %v1676_v41  ;;  %v860_v48 = vrot.slane %v1959_v25, %v1676_v41 }
  0xf9   :  { %v777_v54 = vpop.permute.xlu1 %776  ;;  %v805_v63 = vmul.f32 %v792_v15, %v1877_v16 }
  0xfa   :  { %v1945_v36 = vsel %vm780_vm5, %v777_v54, %v779_v49  ;;  %v1952_v3 = vsel %vm780_vm5, %v775_v8, %v777_v54  ;;  %v742_v8 = vadd.f32 %v738_v7, %v714_v38  ;;  %v808_v49 = vmul.f32 %v804_v22, %v1877_v16 }
  0xfb   :  { %v800_v32 = vrot.slane %v1945_v36, %v1668_v39  ;;  %v796_v35 = vrot.slane %v1952_v3, %v1668_v39  ;;  %v828_v10 = vrot.slane %v1945_v36, %v1672_v40  ;;  %v824_v57 = vrot.slane %v1952_v3, %v1672_v40 }
  0xfc   :  { %v770_v29 = vadd.f32 %v766_v51, %v742_v8  ;;  %v852_v26 = vrot.slane %v1952_v3, %v1676_v41  ;;  %v856_v28 = vrot.slane %v1945_v36, %v1676_v41  ;;  %v812_v13 = vadd.f32 %v808_v49, %v771_v60 }
  0xfd   :  { %v815_v4 = vpop.permute.xlu1 %814  ;;  %v807_v54 = vmul.f32 %v800_v32, %v1877_v16  ;;  %v806_v56 = vmul.f32 %v796_v35, %v1877_v16  ;;  %v876_v16 = vrot.slane %v1966_v43, %v1681_v44  ;;  %v888_v7 = vrot.slane %v1959_v25, %v1681_v44 }
  0xfe   :  { %v835_v61 = vmul.f32 %v828_v10, %v815_v4  ;;  %v836_v2 = vmul.f32 %v832_v59, %v815_v4  ;;  %v833_v17 = vmul.f32 %v820_v11, %v815_v4  ;;  %v834_v19 = vmul.f32 %v824_v57, %v815_v4 }
  0xff   :  { %v811_v0 = vadd.f32 %v807_v54, %v770_v29  ;;  %v810_v9 = vadd.f32 %v806_v56, %v769_v62  ;;  %v861_v31 = vmul.f32 %v848_v12, %v1961_v33  ;;  %v864_v14 = vmul.f32 %v860_v48, %v1961_v33 }
 0x100   :  { %v809_v4 = vadd.f32 %v805_v63, %v768_v6  ;;  %v840_v38 = vadd.f32 %v836_v2, %v812_v13  ;;  %v880_v32 = vrot.slane %v1952_v3, %v1681_v44  ;;  %v884_v25 = vrot.slane %v1945_v36, %v1681_v44  ;;  %v1037_v2 = vpop.permute.xlu0 %1036 }
 0x101   :  { %v839_v20 = vadd.f32 %v835_v61, %v811_v0  ;;  %v838_v45 = vadd.f32 %v834_v19, %v810_v9  ;;  %v862_v35 = vmul.f32 %v852_v26, %v1961_v33  ;;  %v863_v34 = vmul.f32 %v856_v28, %v1961_v33 }
 0x102   :  { %v1970_v18 = vpop.permute.xlu1 %870  ;;  %v837_v1 = vadd.f32 %v833_v17, %v809_v4  ;;  %v868_v50 = vadd.f32 %v864_v14, %v840_v38 }
 0x103   :  { %v867_v47 = vadd.f32 %v863_v34, %v839_v20  ;;  %v891_v33 = vmul.f32 %v884_v25, %v1970_v18  ;;  %v892_v15 = vmul.f32 %v888_v7, %v1970_v18  ;;  %v866_v51 = vadd.f32 %v862_v35, %v838_v45 }
 0x104   :  { %v865_v53 = vadd.f32 %v861_v31, %v837_v1  ;;  %v890_v54 = vmul.f32 %v880_v32, %v1970_v18  ;;  %v1027_v34 = vpop.permute.xlu0 %1026 }
 0x105   :  { %v895_v29 = vadd.f32 %v891_v33, %v867_v47  ;;  %v896_v49 = vadd.f32 %v892_v15, %v868_v50 }
 0x106   :  { %v894_v12 = vadd.f32 %v890_v54, %v866_v51 }
 0x107   :  { %v912_v58 = vpop.permute.xlu1 %911 }
 0x10b   :  { %v900_v24 = vpop.permute.xlu1 %899 }
 0x10c   :  { %v2014_v42 = vsel %vm905_vm6, %v900_v24, %v902_v21  ;;  %v2018_v43 = vsel %vm905_vm6, %v898_v52, %v900_v24 }
 0x10d   :  { %v917_v22 = vrot.slane %v2018_v43, %v1668_v39  ;;  %v921_v3 = vrot.slane %v2014_v42, %v1668_v39  ;;  %v945_v48 = vrot.slane %v2018_v43, %v1672_v40  ;;  %v973_v24 = vrot.slane %v2018_v43, %v1676_v41 }
 0x10e   :  { %v1001_v13 = vrot.slane %v2018_v43, %v1681_v44  ;;  %v1005_v7 = vrot.slane %v2014_v42, %v1681_v44 }
 0x10f   :  { %v904_v23 = vpop.permute.xlu1 %903  ;;  %v930_v57 = vmul.f32 %v917_v22, %v912_v58  ;;  %v931_v62 = vmul.f32 %v921_v3, %v912_v58  ;;  %v958_v26 = vmul.f32 %v945_v48, %v940_v27 }
 0x110   :  { %v906_v30 = vsel %vm905_vm6, %v902_v21, %v904_v23  ;;  %v909_v8 = vsel %vm905_vm6, %v904_v23, %v898_v52  ;;  %v889_v52 = vmul.f32 %v876_v16, %v1970_v18  ;;  %v949_v18 = vrot.slane %v2014_v42, %v1672_v40 }
 0x111   :  { %v925_v36 = vrot.slane %v906_v30, %v1668_v39  ;;  %v929_v46 = vrot.slane %v909_v8, %v1668_v39  ;;  %v953_v59 = vrot.slane %v906_v30, %v1672_v40  ;;  %v957_v63 = vrot.slane %v909_v8, %v1672_v40 }
 0x112   :  { %v893_v11 = vadd.f32 %v889_v52, %v865_v53  ;;  %v981_v19 = vrot.slane %v906_v30, %v1676_v41  ;;  %v985_v21 = vrot.slane %v909_v8, %v1676_v41  ;;  %v977_v16 = vrot.slane %v2014_v42, %v1676_v41 }
 0x113   :  { %v968_v10 = vpop.permute.xlu1 %967  ;;  %v932_v5 = vmul.f32 %v925_v36, %v912_v58  ;;  %v933_v56 = vmul.f32 %v929_v46, %v912_v58  ;;  %v935_v58 = vadd.f32 %v931_v62, %v894_v12  ;;  %v960_v9 = vmul.f32 %v953_v59, %v940_v27  ;;  %v1065_v62 = vpop.permute.xlu0 %1064 }
 0x114   :  { %v934_v6 = vadd.f32 %v930_v57, %v893_v11  ;;  %v961_v17 = vmul.f32 %v957_v63, %v940_v27  ;;  %v959_v28 = vmul.f32 %v949_v18, %v940_v27  ;;  %v986_v32 = vmul.f32 %v973_v24, %v968_v10 }
 0x115   :  { %v936_v60 = vadd.f32 %v932_v5, %v895_v29  ;;  %v937_v0 = vadd.f32 %v933_v56, %v896_v49  ;;  %v987_v25 = vmul.f32 %v977_v16, %v968_v10  ;;  %v1009_v1 = vrot.slane %v906_v30, %v1681_v44 }
 0x116   :  { %v962_v20 = vadd.f32 %v958_v26, %v934_v6  ;;  %v963_v38 = vadd.f32 %v959_v28, %v935_v58  ;;  %v1013_v45 = vrot.slane %v909_v8, %v1681_v44  ;;  %v988_v23 = vmul.f32 %v981_v19, %v968_v10 }
 0x117   :  { %v964_v31 = vadd.f32 %v960_v9, %v936_v60  ;;  %v965_v14 = vadd.f32 %v961_v17, %v937_v0  ;;  %v989_v35 = vmul.f32 %v985_v21, %v968_v10 }
 0x118   :  { %v996_v61 = vpop.permute.xlu1 %995  ;;  %v990_v50 = vadd.f32 %v986_v32, %v962_v20  ;;  %v991_v33 = vadd.f32 %v987_v25, %v963_v38 }
 0x119   :  { %v1014_v22 = vmul.f32 %v1001_v13, %v996_v61  ;;  %v1015_v3 = vmul.f32 %v1005_v7, %v996_v61  ;;  %v992_v43 = vadd.f32 %v988_v23, %v964_v31  ;;  %v993_v36 = vadd.f32 %v989_v35, %v965_v14 }
 0x11a   :  { %v1016_v46 = vmul.f32 %v1009_v1, %v996_v61  ;;  %v1017_v42 = vmul.f32 %v1013_v45, %v996_v61  ;;  %v1160_v1 = vpop.permute.xlu0 %1159 }
 0x11b   :  { %v1018_v53 = vadd.f32 %v1014_v22, %v990_v50  ;;  %v1019_v52 = vadd.f32 %v1015_v3, %v991_v33 }
 0x11c   :  { %v1023_v4 = vpop.permute.xlu1 %1022  ;;  %v1020_v27 = vadd.f32 %v1016_v46, %v992_v43  ;;  %v1021_v5 = vadd.f32 %v1017_v42, %v993_v36 }
 0x120   :  { %v1025_v47 = vpop.permute.xlu1 %1024 }
 0x121   :  { %v1032_v15 = vsel %vm1030_vm7, %v1025_v47, %v1027_v34  ;;  %v1033_v30 = vsel %vm1030_vm7, %v1023_v4, %v1025_v47 }
 0x122   :  { %v1042_v8 = vrot.slane %v1033_v30, %v1668_v39  ;;  %v1046_v51 = vrot.slane %v1032_v15, %v1668_v39  ;;  %v1070_v54 = vrot.slane %v1033_v30, %v1672_v40  ;;  %v1074_v10 = vrot.slane %v1032_v15, %v1672_v40 }
 0x123   :  { %v1098_v49 = vrot.slane %v1033_v30, %v1676_v41  ;;  %v1102_v59 = vrot.slane %v1032_v15, %v1676_v41  ;;  %v1130_v20 = vrot.slane %v1032_v15, %v1681_v44 }
 0x124   :  { %v1055_v56 = vmul.f32 %v1042_v8, %v1037_v2  ;;  %v1056_v57 = vmul.f32 %v1046_v51, %v1037_v2  ;;  %v1029_v29 = vpop.permute.xlu1 %1028  ;;  %v1083_v0 = vmul.f32 %v1070_v54, %v1065_v62  ;;  %v1084_v61 = vmul.f32 %v1074_v10, %v1065_v62 }
 0x125   :  { %v1031_v63 = vsel %vm1030_vm7, %v1027_v34, %v1029_v29  ;;  %v1034_v11 = vsel %vm1030_vm7, %v1029_v29, %v1023_v4  ;;  %v1126_v4 = vrot.slane %v1033_v30, %v1681_v44 }
 0x126   :  { %v1059_v12 = vadd.f32 %v1055_v56, %v1018_v53  ;;  %v1060_v48 = vadd.f32 %v1056_v57, %v1019_v52  ;;  %v1050_v18 = vrot.slane %v1031_v63, %v1668_v39  ;;  %v1054_v60 = vrot.slane %v1034_v11, %v1668_v39  ;;  %v1216_v53 = vpop.permute.xlu0 %1215 }
 0x127   :  { %v1078_v6 = vrot.slane %v1031_v63, %v1672_v40  ;;  %v1082_v58 = vrot.slane %v1034_v11, %v1672_v40  ;;  %v1106_v19 = vrot.slane %v1031_v63, %v1676_v41  ;;  %v1110_v21 = vrot.slane %v1034_v11, %v1676_v41 }
 0x128   :  { %v1057_v9 = vmul.f32 %v1050_v18, %v1037_v2  ;;  %v1058_v17 = vmul.f32 %v1054_v60, %v1037_v2  ;;  %v1093_v55 = vpop.permute.xlu1 %1092  ;;  %v1087_v24 = vadd.f32 %v1083_v0, %v1059_v12  ;;  %v1088_v16 = vadd.f32 %v1084_v61, %v1060_v48 }
 0x129   :  { %v1085_v26 = vmul.f32 %v1078_v6, %v1065_v62  ;;  %v1086_v28 = vmul.f32 %v1082_v58, %v1065_v62  ;;  %v1111_v31 = vmul.f32 %v1098_v49, %v1093_v55  ;;  %v1112_v14 = vmul.f32 %v1102_v59, %v1093_v55 }
 0x12a   :  { %v1061_v13 = vadd.f32 %v1057_v9, %v1020_v27  ;;  %v1062_v7 = vadd.f32 %v1058_v17, %v1021_v5  ;;  %v1113_v2 = vmul.f32 %v1106_v19, %v1093_v55  ;;  %v1114_v25 = vmul.f32 %v1110_v21, %v1093_v55  ;;  %v1300_v21 = vpop.permute.xlu0 %1299 }
 0x12b   :  { %v1134_v45 = vrot.slane %v1031_v63, %v1681_v44  ;;  %v1138_v23 = vrot.slane %v1034_v11, %v1681_v44  ;;  %v1115_v35 = vadd.f32 %v1111_v31, %v1087_v24  ;;  %v1116_v34 = vadd.f32 %v1112_v14, %v1088_v16 }
 0x12c   :  { %v1089_v38 = vadd.f32 %v1085_v26, %v1061_v13  ;;  %v1090_v32 = vadd.f32 %v1086_v28, %v1062_v7  ;;  %v2092_v27 = vsub.s32 5, %v1663_v37  ;;  %v2095_v5 = vsub.s32 4, %v1663_v37 }
 0x12d   :  { %v1121_v22 = vpop.permute.xlu1 %1120  ;;  %v2114_v18 = vsub.s32 6, %v1663_v37  ;;  %v2117_v60 = vsub.s32 7, %v1663_v37 }
 0x12e   :  { %v1117_v3 = vadd.f32 %v1113_v2, %v1089_v38  ;;  %v1118_v43 = vadd.f32 %v1114_v25, %v1090_v32  ;;  %v1139_v36 = vmul.f32 %v1126_v4, %v1121_v22  ;;  %v1140_v46 = vmul.f32 %v1130_v20, %v1121_v22 }
 0x12f   :  { %v1141_v42 = vmul.f32 %v1134_v45, %v1121_v22  ;;  %v1142_v47 = vmul.f32 %v1138_v23, %v1121_v22 }
 0x130   :  { %v1143_v50 = vadd.f32 %v1139_v36, %v1115_v35  ;;  %v1144_v33 = vadd.f32 %v1140_v46, %v1116_v34 }
 0x131   :  { %v1145_v15 = vadd.f32 %v1141_v42, %v1117_v3  ;;  %v1146_v30 = vadd.f32 %v1142_v47, %v1118_v43 }
 0x132   :  { %v2083_v8 = vmax.f32 %v1143_v50, 0.0  ;;  %v2085_v51 = vmax.f32 %v1144_v33, 0.0  ;;  %v1155_v52 = vpop.permute.xlu1 %1154 }
 0x133   :  { %v2087_v54 = vmax.f32 %v1145_v15, 0.0  ;;  %v2089_v10 = vmax.f32 %v1146_v30, 0.0 }
 0x134   :  { %v1221_v56 = vrot.slane %v2083_v8, %v1676_v41  ;;  %v1225_v57 = vrot.slane %v2085_v51, %v1676_v41  ;;  %v1169_v62 = vrot.slane %v2085_v51, %v1668_v39  ;;  %v1165_v29 = vrot.slane %v2083_v8, %v1668_v39 }
 0x135   :  { %v1229_v49 = vrot.slane %v2087_v54, %v1676_v41  ;;  %v1233_v59 = vrot.slane %v2089_v10, %v1676_v41  ;;  %v1173_v63 = vrot.slane %v2087_v54, %v1668_v39  ;;  %v1177_v11 = vrot.slane %v2089_v10, %v1668_v39 }
 0x136   :  { %v1179_v12 = vmul.f32 %v1169_v62, %v1160_v1  ;;  %v1178_v48 = vmul.f32 %v1165_v29, %v1160_v1  ;;  %v1234_v0 = vmul.f32 %v1221_v56, %v1216_v53  ;;  %v1235_v61 = vmul.f32 %v1225_v57, %v1216_v53 }
 0x137   :  { %v1180_v6 = vmul.f32 %v1173_v63, %v1160_v1  ;;  %v1181_v58 = vmul.f32 %v1177_v11, %v1160_v1  ;;  %v1188_v9 = vpop.permute.xlu1 %1187  ;;  %v1236_v41 = vmul.f32 %v1229_v49, %v1216_v53  ;;  %v1237_v17 = vmul.f32 %v1233_v59, %v1216_v53 }
 0x138   :  { %v1182_v19 = vadd.f32 %v1178_v48, %v1155_v52  ;;  %v1309_v39 = vrot.slane %v2085_v51, %v2092_v27  ;;  %v1183_v55 = vadd.f32 %v1179_v12, %v1155_v52  ;;  %v1305_v16 = vrot.slane %v2083_v8, %v2092_v27 }
 0x139   :  { %v1184_v24 = vadd.f32 %v1180_v6, %v1155_v52  ;;  %v1313_v37 = vrot.slane %v2087_v54, %v2092_v27  ;;  %v1185_v26 = vadd.f32 %v1181_v58, %v1155_v52  ;;  %v1317_v28 = vrot.slane %v2089_v10, %v2092_v27 }
 0x13a   :  { %v1197_v13 = vrot.slane %v2085_v51, %v1672_v40  ;;  %v1201_v7 = vrot.slane %v2087_v54, %v1672_v40  ;;  %v1319_v31 = vmul.f32 %v1309_v39, %v1300_v21  ;;  %v1205_v4 = vrot.slane %v2089_v10, %v1672_v40 }
 0x13b   :  { %v1320_v14 = vmul.f32 %v1313_v37, %v1300_v21  ;;  %v1193_v20 = vrot.slane %v2083_v8, %v1672_v40  ;;  %v1253_v2 = vrot.slane %v2085_v51, %v1681_v44  ;;  %v1257_v25 = vrot.slane %v2087_v54, %v1681_v44 }
 0x13c   :  { %v1207_v38 = vmul.f32 %v1197_v13, %v1188_v9  ;;  %v1208_v32 = vmul.f32 %v1201_v7, %v1188_v9  ;;  %v1244_v1 = vpop.permute.xlu1 %1243  ;;  %v1209_v23 = vmul.f32 %v1205_v4, %v1188_v9  ;;  %v1261_v35 = vrot.slane %v2089_v10, %v1681_v44 }
 0x13d   :  { %v1206_v45 = vmul.f32 %v1193_v20, %v1188_v9  ;;  %v1249_v34 = vrot.slane %v2083_v8, %v1681_v44  ;;  %v1263_v40 = vmul.f32 %v1253_v2, %v1244_v1  ;;  %v1264_v43 = vmul.f32 %v1257_v25, %v1244_v1 }
 0x13e   :  { %v1211_v22 = vadd.f32 %v1207_v38, %v1183_v55  ;;  %v1212_v3 = vadd.f32 %v1208_v32, %v1184_v24  ;;  %v1213_v46 = vadd.f32 %v1209_v23, %v1185_v26  ;;  %v1265_v47 = vmul.f32 %v1261_v35, %v1244_v1 }
 0x13f   :  { %v1210_v36 = vadd.f32 %v1206_v45, %v1182_v19  ;;  %v1262_v42 = vmul.f32 %v1249_v34, %v1244_v1  ;;  %v1281_v15 = vrot.slane %v2085_v51, %v2095_v5  ;;  %v1285_v30 = vrot.slane %v2087_v54, %v2095_v5 }
 0x140   :  { %v1239_v50 = vadd.f32 %v1235_v61, %v1211_v22  ;;  %v1240_v33 = vadd.f32 %v1236_v41, %v1212_v3  ;;  %v1241_v53 = vadd.f32 %v1237_v17, %v1213_v46  ;;  %v1289_v44 = vrot.slane %v2089_v10, %v2095_v5 }
 0x141   :  { %v1238_v52 = vadd.f32 %v1234_v0, %v1210_v36  ;;  %v1272_v27 = vpop.permute.xlu1 %1271  ;;  %v1277_v56 = vrot.slane %v2083_v8, %v2095_v5  ;;  %v1337_v0 = vrot.slane %v2085_v51, %v2114_v18  ;;  %v1341_v6 = vrot.slane %v2087_v54, %v2114_v18 }
 0x142   :  { %v1267_v57 = vadd.f32 %v1263_v40, %v1239_v50  ;;  %v1268_v62 = vadd.f32 %v1264_v43, %v1240_v33  ;;  %v1291_v29 = vmul.f32 %v1281_v15, %v1272_v27  ;;  %v1292_v49 = vmul.f32 %v1285_v30, %v1272_v27 }
 0x143   :  { %v1266_v59 = vadd.f32 %v1262_v42, %v1238_v52  ;;  %v1269_v63 = vadd.f32 %v1265_v47, %v1241_v53  ;;  %v1290_v11 = vmul.f32 %v1277_v56, %v1272_v27  ;;  %v1293_v12 = vmul.f32 %v1289_v44, %v1272_v27 }
 0x144   :  { %v1295_v48 = vadd.f32 %v1291_v29, %v1267_v57  ;;  %v1296_v61 = vadd.f32 %v1292_v49, %v1268_v62  ;;  %v1345_v5 = vrot.slane %v2089_v10, %v2114_v18  ;;  %v1333_v41 = vrot.slane %v2083_v8, %v2114_v18 }
 0x145   :  { %v1294_v58 = vadd.f32 %v1290_v11, %v1266_v59  ;;  %v1297_v9 = vadd.f32 %v1293_v12, %v1269_v63  ;;  %v1318_v17 = vmul.f32 %v1305_v16, %v1300_v21  ;;  %v1321_v19 = vmul.f32 %v1317_v28, %v1300_v21 }
 0x146   :  { %v1328_v39 = vpop.permute.xlu1 %1327  ;;  %v1323_v55 = vadd.f32 %v1319_v31, %v1295_v48  ;;  %v1324_v24 = vadd.f32 %v1320_v14, %v1296_v61  ;;  %v1365_v38 = vrot.slane %v2085_v51, %v2117_v60  ;;  %v1369_v32 = vrot.slane %v2087_v54, %v2117_v60 }
 0x147   :  { %v1346_v37 = vmul.f32 %v1333_v41, %v1328_v39  ;;  %v1347_v26 = vmul.f32 %v1337_v0, %v1328_v39  ;;  %v1348_v13 = vmul.f32 %v1341_v6, %v1328_v39  ;;  %v1349_v7 = vmul.f32 %v1345_v5, %v1328_v39 }
 0x148   :  { %v1325_v4 = vadd.f32 %v1321_v19, %v1297_v9  ;;  %v1322_v20 = vadd.f32 %v1318_v17, %v1294_v58  ;;  %v1373_v18 = vrot.slane %v2089_v10, %v2117_v60  ;;  %v1361_v21 = vrot.slane %v2083_v8, %v2117_v60 }
 0x149   :  { %v1351_v16 = vadd.f32 %v1347_v26, %v1323_v55  ;;  %v1352_v28 = vadd.f32 %v1348_v13, %v1324_v24 }
 0x14a   :  { %v1353_v31 = vadd.f32 %v1349_v7, %v1325_v4  ;;  %v1350_v2 = vadd.f32 %v1346_v37, %v1322_v20 }
 0x14b   :  { %v1356_v14 = vpop.permute.xlu1 %1355 }
 0x14c   :  { %v1374_v25 = vmul.f32 %v1361_v21, %v1356_v14  ;;  %v1375_v1 = vmul.f32 %v1365_v38, %v1356_v14  ;;  %v1376_v45 = vmul.f32 %v1369_v32, %v1356_v14  ;;  %v1377_v23 = vmul.f32 %v1373_v18, %v1356_v14 }
 0x14e   :  { %v1378_v35 = vadd.f32 %v1374_v25, %v1350_v2  ;;  %v1379_v51 = vadd.f32 %v1375_v1, %v1351_v16  ;;  %v1380_v34 = vadd.f32 %v1376_v45, %v1352_v28  ;;  %v1381_v22 = vadd.f32 %v1377_v23, %v1353_v31 }
 0x150   :  { %v1382_v54 = vmax.f32 %v1378_v35, 0.0  ;;  %v1383_v3 = vmax.f32 %v1379_v51, 0.0  ;;  %v1384_v40 = vmax.f32 %v1380_v34, 0.0  ;;  %v1385_v10 = vmax.f32 %v1381_v22, 0.0 }
 0x152   :  { %1386 = vst [vmem:[%s2184_s5] sm:$0xff] %v1382_v54  ;;  %1387 = vst [vmem:[%s2184_s5 + $0x8] sm:$0xff] %v1383_v3 }
 0x153   :  { %1388 = vst [vmem:[%s2184_s5 + $0x10] sm:$0xff] %v1384_v40  ;;  %1389 = vst [vmem:[%s2184_s5 + $0x18] sm:$0xff] %v1385_v10 }

</bundles_post_ra>
